<compile_context>
chip_gen: v7x
topology: tpu7x:2x2x1
jax: 0.10.0
libtpu: 0.0.40
codegen_flags: <defaults>
</compile_context>

<pallas_src>
import functools

import jax
import jax.numpy as jnp
from jax.experimental import pallas as pl
from jax.experimental.pallas import tpu as pltpu


# ---------------------------------------------------------------------------
# Hardware-dependent VMEM budget & small helpers
# ---------------------------------------------------------------------------

def _vmem_limit_bytes():
    """Generation-dependent scoped VMEM limit: ~96 MiB on 128 MiB parts
    (v5e/v6e), 48 MiB on v7x (64 MiB physical per TensorCore)."""
    phys = 64 * 1024 * 1024
    try:
        phys = int(pltpu.get_tpu_info().vmem_capacity_bytes)
    except Exception:
        pass
    return max(32 * 1024 * 1024, min(phys * 3 // 4, 100 * 1024 * 1024))


_VMEM_LIMIT = _vmem_limit_bytes()


def _round_up(x, m):
    return ((x + m - 1) // m) * m


def _largest_divisor(n, cap):
    """Largest divisor of n that is <= cap (always >= 1)."""
    cap = max(1, min(n, cap))
    for d in range(cap, 0, -1):
        if n % d == 0:
            return d
    return 1


def _pick_tile(n, cap):
    """Largest divisor of n that is <= cap AND (a multiple of 8 or == n),
    so second-minor block dims satisfy the (8, 128) constraint."""
    cap = max(1, min(n, cap))
    for d in range(cap, 0, -1):
        if n % d == 0 and (d % 8 == 0 or d == n):
            return d
    return n


def _conv_row_tile(H, W, wp, cin, cout, group_size, vmem_limit):
    """Largest output-row tile (divisor of H) whose footprint -- together with
    the double-buffered whole-image slab, weights, f32 accumulator and the
    packed-K LHS temporary -- fits the scoped VMEM limit (lane dims counted
    padded to 128)."""
    cinp = _round_up(cin, 128)
    coutp = _round_up(cout, 128)
    kp = _round_up(group_size * cin, 128)
    fixed = (2 * (H + 3) * wp * cinp * 2      # double-buffered bf16 image slab
             + 2 * 9 * cin * coutp * 2        # double-buffered bf16 weights
             + (2 << 20))                     # bias / semaphores / misc headroom
    avail = max(vmem_limit - fixed, 1 << 20)
    per_row = wp * (2 * coutp * 2             # double-buffered bf16 output tile
                    + coutp * 4               # in-kernel f32 accumulator
                    + kp * 2                  # per-group packed-K LHS temporary
                    + cinp * 2)               # sliced window copy
    return _largest_divisor(H, max(1, avail // per_row))


# ---------------------------------------------------------------------------
# Pallas kernels
# ---------------------------------------------------------------------------

def _conv3x3_kernel(x_ref, w_ref, b_ref, o_ref, *, trh, w_out, wp, group_size):
    """3x3 conv + bias + ReLU over trh output rows with fused im2col.

    x_ref: (1, (H+3)*wp, Cin) bf16 -- whole zero-padded image flattened over
           (row, col) with 8-aligned row stride wp; constant block index along
           the row-tile grid axis => DMA'd from HBM once per image.
    w_ref: (9//group_size, group_size*Cin, Cout) bf16, taps packed along K.
    b_ref: (1, Cout) f32.        o_ref: (1, trh, W, Cout) bf16.
    """
    t = pl.program_id(1)
    ell = trh * wp                       # flattened output positions per tile
    win_len = ell + 3 * wp               # covers all 9 tap offsets, 8-aligned
    start = pl.multiple_of(t * ell, 8)   # ell % 8 == 0 because wp % 8 == 0
    win = x_ref[0, pl.ds(start, win_len), :]          # (win_len, Cin) bf16

    cout = o_ref.shape[-1]
    acc = jnp.zeros((ell, cout), jnp.float32)
    # Fused im2col: tap windows are packed along the lane (K) axis so each
    # matmul feeds the MXU with contraction depth group_size*Cin.
    for g0 in range(0, 9, group_size):
        parts = []
        for tap in range(g0, g0 + group_size):
            dy, dx = tap // 3, tap % 3
            off = dy * wp + dx
            parts.append(win[off:off + ell, :])
        lhs = parts[0] if group_size == 1 else jnp.concatenate(parts, axis=-1)
        acc = acc + jnp.dot(lhs, w_ref[g0 // group_size],
                            preferred_element_type=jnp.float32)
    acc = jnp.maximum(acc + b_ref[...], 0.0)           # bias + ReLU in f32
    # Single aligned store (wp % 8 == 0 makes the reshape layout-free); the
    # wp - W wrap-around junk columns per output row are dropped by the slice.
    out = acc.reshape(trh, wp, cout)[:, :w_out, :]
    o_ref[0] = out.astype(o_ref.dtype)


def _dense_bias_relu_kernel(x_ref, w_ref, b_ref, o_ref):
    # First conv (Cin=3) path: x_ref (TR, 27) bf16 im2col patches,
    # w_ref (27, Cout) bf16, b_ref (1, Cout) f32, o_ref (TR, Cout) bf16.
    acc = jnp.dot(x_ref[...], w_ref[...], preferred_element_type=jnp.float32)
    o_ref[...] = jnp.maximum(acc + b_ref[...], 0.0).astype(o_ref.dtype)


def _maxpool_kernel(x_ref, o_ref, *, c):
    # x_ref: (1, THo, 2, Wo, 2C) -- contiguous reshape, single tensor.
    x = x_ref[...]
    m = jnp.max(x, axis=2)                               # max over the 2 rows
    o_ref[...] = jnp.maximum(m[..., :c], m[..., c:])     # max over the 2 cols


def _l1_kernel(x_ref, y_ref, o_ref, acc_ref, *, inv_numel, r8):
    # Tiled reduction: per-step pure-VPU adds into an (r8, lane) f32 VMEM
    # vector accumulator; cross-lane reduce + SMEM scalar write only at the end.
    @pl.when(pl.program_id(0) == 0)
    def _init():
        acc_ref[...] = jnp.zeros_like(acc_ref)

    d = jnp.abs(x_ref[0].astype(jnp.float32) - y_ref[0].astype(jnp.float32))
    tr, lane = d.shape
    if r8 > 1:
        acc_ref[...] += d.reshape(tr // r8, r8, lane).sum(axis=0)
    else:
        acc_ref[...] += jnp.sum(d, axis=0, keepdims=True)

    @pl.when(pl.program_id(0) == pl.num_programs(0) - 1)
    def _finalize():
        o_ref[0, 0] = jnp.sum(acc_ref[...]) * inv_numel


def _gram_kernel(a_ref, o_ref):
    # a_ref: (1, HW, C) bf16 natural layout; transpose fused into the
    # contraction (A^T A == act @ act^T of the PyTorch (N, C, HW) layout).
    a = a_ref[0]
    o_ref[0] = jax.lax.dot_general(
        a, a, dimension_numbers=(((0,), (0,)), ((), ())),
        preferred_element_type=jnp.float32)


# ---------------------------------------------------------------------------
# Wrappers (only free reshapes / zero-pad / casts happen outside the kernels)
# ---------------------------------------------------------------------------

def conv3x3_bias_relu(x, w_packed, b):
    """relu(conv2d(x, w, padding=1) + b).  x: (N,H,W,Cin), w_packed:
    (9//g, g*Cin, Cout) bf16 tap-packed, b: (1,Cout) f32.  Returns bf16."""
    N, H, W, Cin = x.shape
    n_groups, gcin, Cout = w_packed.shape
    g = gcin // Cin
    wp = _round_up(W + 2, 8)             # 8-aligned flattened row stride
    # halo: 1 top row, 2 bottom rows, 1 left col, (wp - W - 1) right cols.
    xp = jnp.pad(x.astype(jnp.bfloat16),
                 ((0, 0), (1, 2), (1, wp - W - 1), (0, 0)))
    xf = xp.reshape(N, (H + 3) * wp, Cin)

    trh = _conv_row_tile(H, W, wp, Cin, Cout, g, _VMEM_LIMIT)
    grid = (N, H // trh)
    kernel = functools.partial(_conv3x3_kernel, trh=trh, w_out=W, wp=wp,
                               group_size=g)
    return pl.pallas_call(
        kernel,
        out_shape=jax.ShapeDtypeStruct((N, H, W, Cout), jnp.bfloat16),
        grid=grid,
        in_specs=[
            pl.BlockSpec((1, (H + 3) * wp, Cin), lambda n, t: (n, 0, 0)),
            pl.BlockSpec((n_groups, gcin, Cout), lambda n, t: (0, 0, 0)),
            pl.BlockSpec((1, Cout), lambda n, t: (0, 0)),
        ],
        out_specs=pl.BlockSpec((1, trh, W, Cout), lambda n, t: (n, t, 0, 0)),
        compiler_params=pltpu.CompilerParams(
            # batch is the megacore split axis (each core fetches a slab once);
            # the row-tile axis revisits the same slab block -> keep it local.
            dimension_semantics=("parallel", "arbitrary"),
            vmem_limit_bytes=_VMEM_LIMIT),
    )(xf, w_packed, b)


def conv3x3_first(x, wk, b):
    """First VGG conv (Cin=3): wrapper-side im2col to (rows, 27) and a single
    dense K=27 matmul kernel (avoids a 3-lane-wide slab / 9 K=3 MXU passes)."""
    N, H, W, Cin = x.shape
    K, Cout = wk.shape
    xp = jnp.pad(x, ((0, 0), (1, 1), (1, 1), (0, 0)))
    cols = jnp.concatenate(
        [xp[:, dy:dy + H, dx:dx + W, :] for dy in range(3) for dx in range(3)],
        axis=-1)                                          # (N, H, W, 9*Cin)
    rows = N * H * W
    x2 = cols.reshape(rows, K).astype(jnp.bfloat16)
    tr = _pick_tile(rows, 4096)
    out = pl.pallas_call(
        _dense_bias_relu_kernel,
        out_shape=jax.ShapeDtypeStruct((rows, Cout), jnp.bfloat16),
        grid=(rows // tr,),
        in_specs=[pl.BlockSpec((tr, K), lambda i: (i, 0)),
                  pl.BlockSpec((K, Cout), lambda i: (0, 0)),
                  pl.BlockSpec((1, Cout), lambda i: (0, 0))],
        out_specs=pl.BlockSpec((tr, Cout), lambda i: (i, 0)),
        compiler_params=pltpu.CompilerParams(
            dimension_semantics=("parallel",),
            vmem_limit_bytes=_VMEM_LIMIT),
    )(x2, wk, b)
    return out.reshape(N, H, W, Cout)


def maxpool2x2(x):
    """MaxPool2d(kernel_size=2, stride=2).  x: (N,H,W,C) with even H, W."""
    N, H, W, C = x.shape
    Ho, Wo = H // 2, W // 2
    x5 = x.reshape(N, Ho, 2, Wo, 2 * C)            # contiguous view, free
    row_bytes = 2 * Wo * 2 * max(C, 128) * x.dtype.itemsize
    tho = _largest_divisor(Ho, max(1, (4 * 1024 * 1024) // row_bytes))
    return pl.pallas_call(
        functools.partial(_maxpool_kernel, c=C),
        out_shape=jax.ShapeDtypeStruct((N, Ho, Wo, C), x.dtype),
        grid=(N, Ho // tho),
        in_specs=[pl.BlockSpec((1, tho, 2, Wo, 2 * C),
                               lambda n, t: (n, t, 0, 0, 0))],
        out_specs=pl.BlockSpec((1, tho, Wo, C), lambda n, t: (n, t, 0, 0)),
        compiler_params=pltpu.CompilerParams(
            dimension_semantics=("parallel", "parallel"),
            vmem_limit_bytes=_VMEM_LIMIT),
    )(x5)


def l1_loss(x, y):
    """Mean absolute error over all elements (== F.l1_loss default)."""
    total = x.size
    lane = _largest_divisor(total, 2048)                 # lane-dense columns
    rows = total // lane
    tr = _pick_tile(rows, max(1, (1 << 20) // lane))     # ~4 MiB f32-eq blocks
    r8 = 8 if tr % 8 == 0 else 1
    g = rows // tr
    x3 = x.reshape(g, tr, lane)                          # free views
    y3 = y.reshape(g, tr, lane)
    inv = 1.0 / float(total)
    out = pl.pallas_call(
        functools.partial(_l1_kernel, inv_numel=inv, r8=r8),
        out_shape=jax.ShapeDtypeStruct((1, 1), jnp.float32),
        grid=(g,),
        in_specs=[pl.BlockSpec((1, tr, lane), lambda i: (i, 0, 0)),
                  pl.BlockSpec((1, tr, lane), lambda i: (i, 0, 0))],
        out_specs=pl.BlockSpec((1, 1), lambda i: (0, 0),
                               memory_space=pltpu.MemorySpace.SMEM),
        scratch_shapes=[pltpu.VMEM((r8, lane), jnp.float32)],
        compiler_params=pltpu.CompilerParams(
            dimension_semantics=("arbitrary",),          # sequential reduction
            vmem_limit_bytes=_VMEM_LIMIT),
    )(x3, y3)
    return out[0, 0]


def gram_matrix(x):
    """gram[n] = act @ act^T with act = reshape(x_nchw, (N, C, H*W))."""
    N, H, W, C = x.shape
    act = x.reshape(N, H * W, C)                   # free view, no transpose
    return pl.pallas_call(
        _gram_kernel,
        out_shape=jax.ShapeDtypeStruct((N, C, C), jnp.float32),
        grid=(N,),
        in_specs=[pl.BlockSpec((1, H * W, C), lambda n: (n, 0, 0))],
        out_specs=pl.BlockSpec((1, C, C), lambda n: (n, 0, 0)),
        compiler_params=pltpu.CompilerParams(
            dimension_semantics=("parallel",),
            vmem_limit_bytes=_VMEM_LIMIT),
    )(act)


# ---------------------------------------------------------------------------
# VGG16-feature blocks & perceptual loss module
# ---------------------------------------------------------------------------

_VGG16_CONVS = [
    [(3, 64), (64, 64)],                   # features[:4]
    [(64, 128), (128, 128)],               # features[4:9]   (starts with maxpool)
    [(128, 256), (256, 256), (256, 256)],  # features[9:16]  (starts with maxpool)
    [(256, 512), (512, 512), (512, 512)],  # features[16:23] (starts with maxpool)
]


def _tap_group_size(cin):
    # Pack taps along K so the MXU contraction depth is >= 192 on the
    # Cin=64/128 layers; Cin>=256 already saturates a 128/256-deep MXU.
    return 3 if cin <= 128 else 1


class VGGPerceptualLoss:
    """JAX/Pallas port of the PyTorch VGGPerceptualLoss forward pass."""

    def __init__(self, resize=True):
        self.resize = resize
        self.mean = jnp.array([0.485, 0.456, 0.406], jnp.float32).reshape(1, 3, 1, 1)
        self.std = jnp.array([0.229, 0.224, 0.225], jnp.float32).reshape(1, 3, 1, 1)
        # TODO(synk): torchvision's pretrained VGG16 weights cannot be loaded in a
        # self-contained script; deterministic He-init stand-ins are used instead.
        key = jax.random.PRNGKey(0)
        self.blocks = []
        for block_cfg in _VGG16_CONVS:
            params = []
            for cin, cout in block_cfg:
                key, kw = jax.random.split(key)
                w = (jax.random.normal(kw, (3, 3, cin, cout), jnp.float32)
                     * jnp.sqrt(2.0 / (9.0 * cin)))
                bias = jnp.zeros((1, cout), jnp.float32)
                if cin == 3:
                    # first conv: wrapper-side im2col, (27, Cout) dense weight.
                    params.append(("dense",
                                   w.reshape(9 * cin, cout).astype(jnp.bfloat16),
                                   bias))
                else:
                    g = _tap_group_size(cin)
                    wg = w.reshape(9, cin, cout).reshape(9 // g, g * cin, cout)
                    params.append(("slab", wg.astype(jnp.bfloat16), bias))
            self.blocks.append(params)

    def _run_block(self, x, block_idx):
        if block_idx > 0:                       # blocks 1..3 begin with MaxPool2d(2,2)
            x = maxpool2x2(x)
        for kind, w, b in self.blocks[block_idx]:   # each conv fused with its ReLU
            x = conv3x3_first(x, w, b) if kind == "dense" else conv3x3_bias_relu(x, w, b)
        return x

    def __call__(self, input, target, feature_layers=(0, 1, 2, 3), style_layers=()):
        # input/target: NCHW float32, like the PyTorch reference.
        if input.shape[1] != 3:
            input = jnp.tile(input, (1, 3, 1, 1))     # == torch .repeat(1,3,1,1)
            target = jnp.tile(target, (1, 3, 1, 1))
        input = (input - self.mean) / self.std
        target = (target - self.mean) / self.std
        x = jnp.transpose(input, (0, 2, 3, 1))        # NCHW -> NHWC (C -> lanes)
        y = jnp.transpose(target, (0, 2, 3, 1))
        if self.resize:
            # bilinear, align_corners=False (half-pixel), no antialias (== torch)
            n0 = x.shape[0]
            x = jax.image.resize(x, (n0, 224, 224, 3), method="bilinear", antialias=False)
            y = jax.image.resize(y, (n0, 224, 224, 3), method="bilinear", antialias=False)
        n = x.shape[0]
        # Run input & target through the shared VGG blocks as one 2N batch:
        # halves the pallas_call count, balanced megacore batch axis.
        z = jnp.concatenate([x, y], axis=0)
        loss = jnp.float32(0.0)
        for i in range(4):
            z = self._run_block(z, i)
            if i in feature_layers:
                loss = loss + l1_loss(z[:n], z[n:])
            if i in style_layers:
                gz = gram_matrix(z)
                loss = loss + l1_loss(gz[:n], gz[n:])
        return loss


if __name__ == "__main__":
    key = jax.random.PRNGKey(0)
    k_in, k_tg = jax.random.split(key)
    # 1-channel inputs exercise the channel-repeat path; small 16x16 spatial.
    inp = jax.random.uniform(k_in, (2, 1, 16, 16), dtype=jnp.float32)
    tgt = jax.random.uniform(k_tg, (2, 1, 16, 16), dtype=jnp.float32)
    # resize=False keeps the demo shapes small; the resize=True (224x224) path
    # is implemented and all conv tiles are derived from the VMEM budget.
    model = VGGPerceptualLoss(resize=False)
    loss = model(inp, tgt, feature_layers=[0, 1, 2, 3], style_layers=[2, 3])
    jax.block_until_ready(loss)
    print("KERNEL_OK")
</pallas_src>

<mosaic_0001>
module attributes {stable_mosaic.version = 11 : i64} {
  func.func @_dense_bias_relu_kernel(%arg0: i32, %arg1: memref<1024x27xbf16, #tpu.memory_space<vmem>>, %arg2: memref<27x64xbf16, #tpu.memory_space<vmem>>, %arg3: memref<1x64xf32, #tpu.memory_space<vmem>>, %arg4: memref<1024x64xbf16, #tpu.memory_space<vmem>>) attributes {dimension_semantics = [#tpu.dimension_semantics<parallel>], iteration_bounds = array<i64: 1>, scalar_prefetch = 0 : i64, scratch_operands = 0 : i64, tpu.core_type = #tpu.core_type<tc>, window_params = [{transform_indices = @transform_0, window_bounds = array<i64: 1024, 27>}, {pipeline_mode = #tpu.pipeline_mode<synchronous>, transform_indices = @transform_1, window_bounds = array<i64: 27, 64>}, {pipeline_mode = #tpu.pipeline_mode<synchronous>, transform_indices = @transform_2, window_bounds = array<i64: 1, 64>}, {transform_indices = @transform_3, window_bounds = array<i64: 1024, 64>}]} {
    %c0 = arith.constant 0 : index
    %c0_0 = arith.constant 0 : index
    %0 = vector.load %arg1[%c0, %c0_0] : memref<1024x27xbf16, #tpu.memory_space<vmem>>, vector<1024x27xbf16>
    %c0_1 = arith.constant 0 : index
    %c0_2 = arith.constant 0 : index
    %1 = vector.load %arg2[%c0_1, %c0_2] : memref<27x64xbf16, #tpu.memory_space<vmem>>, vector<27x64xbf16>
    %cst = arith.constant dense<0.000000e+00> : vector<1024x64xf32>
    %2 = tpu.matmul %0, %1, %cst {dimension_numbers = #tpu.dot_dimension_numbers<[1], [0], [0], [1], [0, 0, 1, 1], [], []>} : vector<1024x27xbf16>, vector<27x64xbf16>, vector<1024x64xf32> -> vector<1024x64xf32>
    %c0_3 = arith.constant 0 : index
    %c0_4 = arith.constant 0 : index
    %3 = vector.load %arg3[%c0_3, %c0_4] : memref<1x64xf32, #tpu.memory_space<vmem>>, vector<1x64xf32>
    %4 = vector.broadcast %3 : vector<1x64xf32> to vector<1024x64xf32>
    %5 = arith.addf %2, %4 : vector<1024x64xf32>
    %cst_5 = arith.constant 0.000000e+00 : f32
    %6 = vector.broadcast %cst_5 : f32 to vector<1024x64xf32>
    %7 = arith.maximumf %5, %6 : vector<1024x64xf32>
    %8 = arith.truncf %7 : vector<1024x64xf32> to vector<1024x64xbf16>
    %c0_6 = arith.constant 0 : index
    %c0_7 = arith.constant 0 : index
    %9 = vector.load %arg4[%c0_6, %c0_7] : memref<1024x64xbf16, #tpu.memory_space<vmem>>, vector<1024x64xbf16>
    tpu.vector_store %arg4[%c0_6, %c0_7], %8 {strides = array<i32>} : memref<1024x64xbf16, #tpu.memory_space<vmem>>, vector<1024x64xbf16>,
    return
  }
  func.func @transform_0(%arg0: i32) -> (i32, i32) {
    %c0_i32 = arith.constant 0 : i32
    %c0_i32_0 = arith.constant 0 : i32
    return %arg0, %c0_i32 : i32, i32
  }
  func.func @transform_1(%arg0: i32) -> (i32, i32) {
    %c0_i32 = arith.constant 0 : i32
    %c0_i32_0 = arith.constant 0 : i32
    %c0_i32_1 = arith.constant 0 : i32
    return %c0_i32, %c0_i32_0 : i32, i32
  }
  func.func @transform_2(%arg0: i32) -> (i32, i32) {
    %c0_i32 = arith.constant 0 : i32
    %c0_i32_0 = arith.constant 0 : i32
    %c0_i32_1 = arith.constant 0 : i32
    return %c0_i32, %c0_i32_0 : i32, i32
  }
  func.func @transform_3(%arg0: i32) -> (i32, i32) {
    %c0_i32 = arith.constant 0 : i32
    %c0_i32_0 = arith.constant 0 : i32
    return %arg0, %c0_i32 : i32, i32
  }
}

</mosaic_0001>

<bundles_post_ra>
// kernel: tpu_custom_call.1
= control target key start
LH: loop header
LB: loop body
LE: loop exit
PB: predicated region body
PF: predicated region fallthrough
CT: control target
= control target key end

     0   :  { %vm678_vm0 = vcmask 1044480   ;;  %vm679_vm1 = vcmask 1045504   ;;  %vm485_vm2 = vcmask 220160   ;;  %v2660_v1 = vmov 65535   ;;  %s3593_s1 = inlined_call_operand.vmem [shape: bf16[27,64], index: 1, kind: input, shape index: {}]   ;;  %s3594_s0 = inlined_call_operand.vmem [shape: bf16[1024,27], index: 0, kind: input, shape index: {}]   ;;  %s3595_s2 = inlined_call_operand.vmem [shape: f32[1,64], index: 2, kind: input, shape index: {}]   ;;  %s3596_s3 = inlined_call_operand.vmem [shape: bf16[1024,64], index: 3, kind: output, shape index: {}]  }
   0x1   :  { %v2593_v0 = vld [vmem:[%s3593_s1] sm:$0xff]   ;;  %v680_v2 = vsel %vm678_vm0, 4294967295, %v2660_v1  ;;  %v2594_v3 = vld [vmem:[%s3593_s1 + $0x8] sm:$0x3f]   ;;  %v2599_v10 = vld [vmem:[%s3594_s0 + $0x10] sm:$0xff]   ;;  %vm1870_vm3 = vcmask 519168  }
   0x2   :  { %2456 = vmatprep.subr.bf16.mxu0 %v2593_v0  ;;  %2588 = vmatprep.subr.bf16.mxu1 %v2593_v0  ;;  %v681_v4 = vsel %vm679_vm1, %v680_v2, 0  ;;  %v2595_v5 = vld [vmem:[%s3594_s0] sm:$0xff]   ;;  %v2597_v8 = vld [vmem:[%s3594_s0 + $0x8] sm:$0xff]   ;;  %v2600_v11 = vld [vmem:[%s3594_s0 + $0x110] sm:$0xff]  }
   0x3   :  { %2457 = vmatpush3.bf16.msra.mxu0 %v2593_v0  ;;  %2590 = vmatpush3.bf16.msra.mxu1 %v2593_v0  ;;  %v683_v6 = vand.u32 %v2594_v3, %v681_v4  ;;  %v2596_v7 = vld [vmem:[%s3594_s0 + $0x100] sm:$0xff]   ;;  %v2598_v9 = vld [vmem:[%s3594_s0 + $0x108] sm:$0xff]   ;;  %v2601_v12 = vld [vmem:[%s3594_s0 + $0x18] sm:$0xff]  }
   0x4   :  { %2460 = vmatprep.mubr.msk.bf16.mxu0 %vm485_vm2, %v2595_v5  ;;  %2524 = vmatprep.mubr.msk.bf16.mxu1 %vm485_vm2, %v2596_v7  ;;  %v2602_v13 = vld [vmem:[%s3594_s0 + $0x118] sm:$0xff]   ;;  %v2603_v14 = vld [vmem:[%s3594_s0 + $0x20] sm:$0xff]   ;;  %v2605_v16 = vld [vmem:[%s3594_s0 + $0x28] sm:$0xff]  }
   0x5   :  { %2458 = vmatprep.subr.bf16.mxu0 %v683_v6  ;;  %2589 = vmatprep.subr.bf16.mxu1 %v683_v6  ;;  %v2604_v15 = vld [vmem:[%s3594_s0 + $0x120] sm:$0xff]   ;;  %v2606_v17 = vld [vmem:[%s3594_s0 + $0x128] sm:$0xff]   ;;  %v2607_v18 = vld [vmem:[%s3594_s0 + $0x30] sm:$0xff]  }
   0x6   :  { %v2608_v19 = vld [vmem:[%s3594_s0 + $0x130] sm:$0xff]   ;;  %v2609_v20 = vld [vmem:[%s3594_s0 + $0x38] sm:$0xff]   ;;  %v2611_v22 = vld [vmem:[%s3594_s0 + $0x40] sm:$0xff]  }
   0x7   :  { %2459 = vmatpush3.bf16.msra.mxu0 %v683_v6  ;;  %2591 = vmatpush3.bf16.msra.mxu1 %v683_v6  ;;  %v2610_v21 = vld [vmem:[%s3594_s0 + $0x138] sm:$0xff]   ;;  %v2612_v23 = vld [vmem:[%s3594_s0 + $0x140] sm:$0xff]   ;;  %v2613_v24 = vld [vmem:[%s3594_s0 + $0x48] sm:$0xff]  }
   0x8   :  { %v2614_v25 = vld [vmem:[%s3594_s0 + $0x148] sm:$0xff]   ;;  %v2615_v26 = vld [vmem:[%s3594_s0 + $0x50] sm:$0xff]   ;;  %v2617_v28 = vld [vmem:[%s3594_s0 + $0x58] sm:$0xff]  }
   0x9   :  { %v2616_v27 = vld [vmem:[%s3594_s0 + $0x150] sm:$0xff]   ;;  %v2618_v29 = vld [vmem:[%s3594_s0 + $0x158] sm:$0xff]   ;;  %v2619_v30 = vld [vmem:[%s3594_s0 + $0x60] sm:$0xff]  }
   0xa   :  { %2461 = vmatmul.mubr.msk.bf16.vlgmr.msra.gmra.mrb[0].mxu0 %vm485_vm2, %v2597_v8  ;;  %2525 = vmatmul.mubr.msk.bf16.vlgmr.msra.gmra.mrb[0].mxu1 %vm485_vm2, %v2598_v9  ;;  %v2620_v31 = vld [vmem:[%s3594_s0 + $0x160] sm:$0xff]   ;;  %v2621_v32 = vld [vmem:[%s3594_s0 + $0x68] sm:$0xff]   ;;  %v2623_v34 = vld [vmem:[%s3594_s0 + $0x70] sm:$0xff]  }
   0xb   :  { %2464 = vmatprep.mubr.msk.bf16.mxu0 %vm485_vm2, %v2599_v10  ;;  %2528 = vmatprep.mubr.msk.bf16.mxu1 %vm485_vm2, %v2600_v11  ;;  %v2622_v33 = vld [vmem:[%s3594_s0 + $0x168] sm:$0xff]   ;;  %v2624_v35 = vld [vmem:[%s3594_s0 + $0x170] sm:$0xff]   ;;  %v2625_v36 = vld [vmem:[%s3594_s0 + $0x78] sm:$0xff]  }
   0xc   :  { %v2626_v37 = vld [vmem:[%s3594_s0 + $0x178] sm:$0xff]   ;;  %v2627_v38 = vld [vmem:[%s3594_s0 + $0x80] sm:$0xff]   ;;  %v2629_v40 = vld [vmem:[%s3594_s0 + $0x88] sm:$0xff]  }
   0xd   :  { %v2628_v39 = vld [vmem:[%s3594_s0 + $0x180] sm:$0xff]   ;;  %v2630_v41 = vld [vmem:[%s3594_s0 + $0x188] sm:$0xff]   ;;  %v2631_v42 = vld [vmem:[%s3594_s0 + $0x90] sm:$0xff]  }
   0xe   :  { %v2632_v43 = vld [vmem:[%s3594_s0 + $0x190] sm:$0xff]   ;;  %v2633_v44 = vld [vmem:[%s3594_s0 + $0x98] sm:$0xff]   ;;  %v2635_v46 = vld [vmem:[%s3594_s0 + $0xa0] sm:$0xff]  }
   0xf   :  { %v2634_v45 = vld [vmem:[%s3594_s0 + $0x198] sm:$0xff]   ;;  %v2636_v47 = vld [vmem:[%s3594_s0 + $0x1a0] sm:$0xff]   ;;  %v2637_v48 = vld [vmem:[%s3594_s0 + $0xa8] sm:$0xff]  }
  0x10   :  { %v2638_v49 = vld [vmem:[%s3594_s0 + $0x1a8] sm:$0xff]   ;;  %v2639_v50 = vld [vmem:[%s3594_s0 + $0xb0] sm:$0xff]   ;;  %v2641_v52 = vld [vmem:[%s3594_s0 + $0xb8] sm:$0xff]  }
  0x11   :  { %v2640_v51 = vld [vmem:[%s3594_s0 + $0x1b0] sm:$0xff]   ;;  %v2642_v53 = vld [vmem:[%s3594_s0 + $0x1b8] sm:$0xff]   ;;  %v2643_v54 = vld [vmem:[%s3594_s0 + $0xc0] sm:$0xff]  }
  0x12   :  { %2465 = vmatmul.mubr.msk.bf16.gmra.mrb[4].mxu0 %vm485_vm2, %v2601_v12  ;;  %2529 = vmatmul.mubr.msk.bf16.gmra.mrb[4].mxu1 %vm485_vm2, %v2602_v13  ;;  %v2644_v55 = vld [vmem:[%s3594_s0 + $0x1c0] sm:$0xff]   ;;  %v2645_v56 = vld [vmem:[%s3594_s0 + $0xc8] sm:$0xff]   ;;  %v2647_v58 = vld [vmem:[%s3594_s0 + $0xd0] sm:$0xff]  }
  0x13   :  { %2468 = vmatprep.mubr.msk.bf16.mxu0 %vm485_vm2, %v2603_v14  ;;  %2532 = vmatprep.mubr.msk.bf16.mxu1 %vm485_vm2, %v2604_v15  ;;  %v2646_v57 = vld [vmem:[%s3594_s0 + $0x1c8] sm:$0xff]   ;;  %v2648_v59 = vld [vmem:[%s3594_s0 + $0x1d0] sm:$0xff]   ;;  %v2649_v60 = vld [vmem:[%s3594_s0 + $0xd8] sm:$0xff]  }
  0x14   :  { %v2650_v61 = vld [vmem:[%s3594_s0 + $0x1d8] sm:$0xff]   ;;  %v2651_v62 = vld [vmem:[%s3594_s0 + $0xe0] sm:$0xff]   ;;  %v2653_v0 = vld [vmem:[%s3594_s0 + $0xe8] sm:$0xff]  }
  0x15   :  { %v2652_v63 = vld [vmem:[%s3594_s0 + $0x1e0] sm:$0xff]   ;;  %v2654_v1 = vld [vmem:[%s3594_s0 + $0x1e8] sm:$0xff]   ;;  %v2655_v2 = vld [vmem:[%s3594_s0 + $0xf0] sm:$0xff]  }
  0x16   :  { %v2656_v3 = vld [vmem:[%s3594_s0 + $0x1f0] sm:$0xff]   ;;  %v2657_v4 = vld [vmem:[%s3594_s0 + $0xf8] sm:$0xff]   ;;  %v2946_v6 = vld [vmem:[%s3595_s2] ss:$0 sm:$0xff] }
  0x17   :  { %v2658_v5 = vld [vmem:[%s3594_s0 + $0x1f8] sm:$0xff]  }
  0x1a   :  { %2469 = vmatmul.mubr.msk.bf16.gmra.mrb[8].mxu0 %vm485_vm2, %v2605_v16  ;;  %2533 = vmatmul.mubr.msk.bf16.gmra.mrb[8].mxu1 %vm485_vm2, %v2606_v17 }
  0x1b   :  { %2472 = vmatprep.mubr.msk.bf16.mxu0 %vm485_vm2, %v2607_v18  ;;  %2536 = vmatprep.mubr.msk.bf16.mxu1 %vm485_vm2, %v2608_v19 }
  0x22   :  { %2473 = vmatmul.mubr.msk.bf16.gmra.mrb[12].mxu0 %vm485_vm2, %v2609_v20  ;;  %2537 = vmatmul.mubr.msk.bf16.gmra.mrb[12].mxu1 %vm485_vm2, %v2610_v21 }
  0x23   :  { %2476 = vmatprep.mubr.msk.bf16.mxu0 %vm485_vm2, %v2611_v22  ;;  %2540 = vmatprep.mubr.msk.bf16.mxu1 %vm485_vm2, %v2612_v23 }
  0x2a   :  { %2477 = vmatmul.mubr.msk.bf16.gmra.mrb[16].mxu0 %vm485_vm2, %v2613_v24  ;;  %2541 = vmatmul.mubr.msk.bf16.gmra.mrb[16].mxu1 %vm485_vm2, %v2614_v25 }
  0x2b   :  { %2480 = vmatprep.mubr.msk.bf16.mxu0 %vm485_vm2, %v2615_v26  ;;  %2544 = vmatprep.mubr.msk.bf16.mxu1 %vm485_vm2, %v2616_v27 }
  0x32   :  { %2481 = vmatmul.mubr.msk.bf16.gmra.mrb[20].mxu0 %vm485_vm2, %v2617_v28  ;;  %2545 = vmatmul.mubr.msk.bf16.gmra.mrb[20].mxu1 %vm485_vm2, %v2618_v29 }
  0x33   :  { %2484 = vmatprep.mubr.msk.bf16.mxu0 %vm485_vm2, %v2619_v30  ;;  %2548 = vmatprep.mubr.msk.bf16.mxu1 %vm485_vm2, %v2620_v31 }
  0x3a   :  { %2485 = vmatmul.mubr.msk.bf16.gmra.mrb[24].mxu0 %vm485_vm2, %v2621_v32  ;;  %2549 = vmatmul.mubr.msk.bf16.gmra.mrb[24].mxu1 %vm485_vm2, %v2622_v33 }
  0x3b   :  { %2488 = vmatprep.mubr.msk.bf16.mxu0 %vm485_vm2, %v2623_v34  ;;  %2552 = vmatprep.mubr.msk.bf16.mxu1 %vm485_vm2, %v2624_v35 }
  0x42   :  { %2489 = vmatmul.mubr.msk.bf16.gmra.mrb[28].mxu0 %vm485_vm2, %v2625_v36  ;;  %2553 = vmatmul.mubr.msk.bf16.gmra.mrb[28].mxu1 %vm485_vm2, %v2626_v37 }
  0x43   :  { %2492 = vmatprep.mubr.msk.bf16.mxu0 %vm485_vm2, %v2627_v38  ;;  %2556 = vmatprep.mubr.msk.bf16.mxu1 %vm485_vm2, %v2628_v39 }
  0x4a   :  { %2493 = vmatmul.mubr.msk.bf16.gmra.mrb[32].mxu0 %vm485_vm2, %v2629_v40  ;;  %2557 = vmatmul.mubr.msk.bf16.gmra.mrb[32].mxu1 %vm485_vm2, %v2630_v41 }
  0x4b   :  { %2496 = vmatprep.mubr.msk.bf16.mxu0 %vm485_vm2, %v2631_v42  ;;  %2560 = vmatprep.mubr.msk.bf16.mxu1 %vm485_vm2, %v2632_v43 }
  0x52   :  { %2497 = vmatmul.mubr.msk.bf16.gmra.mrb[36].mxu0 %vm485_vm2, %v2633_v44  ;;  %2561 = vmatmul.mubr.msk.bf16.gmra.mrb[36].mxu1 %vm485_vm2, %v2634_v45 }
  0x53   :  { %2500 = vmatprep.mubr.msk.bf16.mxu0 %vm485_vm2, %v2635_v46  ;;  %2564 = vmatprep.mubr.msk.bf16.mxu1 %vm485_vm2, %v2636_v47 }
  0x5a   :  { %2501 = vmatmul.mubr.msk.bf16.gmra.mrb[40].mxu0 %vm485_vm2, %v2637_v48  ;;  %2565 = vmatmul.mubr.msk.bf16.gmra.mrb[40].mxu1 %vm485_vm2, %v2638_v49 }
  0x5b   :  { %2504 = vmatprep.mubr.msk.bf16.mxu0 %vm485_vm2, %v2639_v50  ;;  %2568 = vmatprep.mubr.msk.bf16.mxu1 %vm485_vm2, %v2640_v51 }
  0x62   :  { %2505 = vmatmul.mubr.msk.bf16.gmra.mrb[44].mxu0 %vm485_vm2, %v2641_v52  ;;  %2569 = vmatmul.mubr.msk.bf16.gmra.mrb[44].mxu1 %vm485_vm2, %v2642_v53 }
  0x63   :  { %2508 = vmatprep.mubr.msk.bf16.mxu0 %vm485_vm2, %v2643_v54  ;;  %2572 = vmatprep.mubr.msk.bf16.mxu1 %vm485_vm2, %v2644_v55 }
  0x6a   :  { %2509 = vmatmul.mubr.msk.bf16.gmra.mrb[48].mxu0 %vm485_vm2, %v2645_v56  ;;  %2573 = vmatmul.mubr.msk.bf16.gmra.mrb[48].mxu1 %vm485_vm2, %v2646_v57 }
  0x6b   :  { %2512 = vmatprep.mubr.msk.bf16.mxu0 %vm485_vm2, %v2647_v58  ;;  %2576 = vmatprep.mubr.msk.bf16.mxu1 %vm485_vm2, %v2648_v59 }
  0x72   :  { %2513 = vmatmul.mubr.msk.bf16.gmra.mrb[52].mxu0 %vm485_vm2, %v2649_v60  ;;  %2577 = vmatmul.mubr.msk.bf16.gmra.mrb[52].mxu1 %vm485_vm2, %v2650_v61 }
  0x73   :  { %2516 = vmatprep.mubr.msk.bf16.mxu0 %vm485_vm2, %v2651_v62  ;;  %2580 = vmatprep.mubr.msk.bf16.mxu1 %vm485_vm2, %v2652_v63 }
  0x7a   :  { %2517 = vmatmul.mubr.msk.bf16.gmra.mrb[56].mxu0 %vm485_vm2, %v2653_v0  ;;  %2581 = vmatmul.mubr.msk.bf16.gmra.mrb[56].mxu1 %vm485_vm2, %v2654_v1 }
  0x7b   :  { %2520 = vmatprep.mubr.msk.bf16.mxu0 %vm485_vm2, %v2655_v2  ;;  %2584 = vmatprep.mubr.msk.bf16.mxu1 %vm485_vm2, %v2656_v3 }
  0x82   :  { %2521 = vmatmul.mubr.msk.bf16.gmra.mrb[60].mxu0 %vm485_vm2, %v2657_v4  ;;  %2585 = vmatmul.mubr.msk.bf16.gmra.mrb[60].mxu1 %vm485_vm2, %v2658_v5 }
  0xdd   :  { %v2462_v7 = vpop.f32.mrb[0].mxu0  ;;  %v2526_v8 = vpop.f32.mrb[0].mxu1 }
  0xde   :  { %v728_v9 = vadd.f32 %v2462_v7, %v2946_v6  ;;  %v984_v10 = vadd.f32 %v2526_v8, %v2946_v6  ;;  %v719_v11 = vpop.f32.mrb[1].mxu0  ;;  %v975_v12 = vpop.f32.mrb[1].mxu1 }
  0xdf   :  { %v720_v13 = vadd.f32 %v2946_v6, %v719_v11  ;;  %v976_v14 = vadd.f32 %v2946_v6, %v975_v12  ;;  %v2463_v15 = vpop.f32.mrb[2].mxu0  ;;  %v2527_v16 = vpop.f32.mrb[2].mxu1 }
  0xe0   :  { %v1232_v17 = vmax.f32 %v728_v9, 0.0  ;;  %v1296_v18 = vmax.f32 %v984_v10, 0.0  ;;  %v731_v19 = vadd.f32 %v2463_v15, %v2946_v6  ;;  %v987_v20 = vadd.f32 %v2527_v16, %v2946_v6  ;;  %v722_v21 = vpop.f32.mrb[3].mxu0  ;;  %v978_v22 = vpop.f32.mrb[3].mxu1 }
  0xe1   :  { %v1230_v23 = vmax.f32 %v720_v13, 0.0  ;;  %v1294_v24 = vmax.f32 %v976_v14, 0.0  ;;  %v723_v25 = vadd.f32 %v2946_v6, %v722_v21  ;;  %v979_v26 = vadd.f32 %v2946_v6, %v978_v22 }
  0xe2   :  { %v2264_v27 = vpack.c.bf16 %v1232_v17, %v1232_v17  ;;  %v2328_v28 = vpack.c.bf16 %v1296_v18, %v1296_v18  ;;  %v1233_v29 = vmax.f32 %v731_v19, 0.0  ;;  %v1297_v30 = vmax.f32 %v987_v20, 0.0 }
  0xe3   :  { %v2262_v31 = vpack.c.bf16 %v1230_v23, %v1230_v23  ;;  %v2326_v32 = vpack.c.bf16 %v1294_v24, %v1294_v24  ;;  %v1231_v33 = vmax.f32 %v723_v25, 0.0  ;;  %v1295_v34 = vmax.f32 %v979_v26, 0.0 }
  0xe4   :  { %1873 = vst.msk [vmem:[%s3596_s3 + $0x8] sm:$0xf] %vm1870_vm3, %v2264_v27  ;;  %1937 = vst.msk [vmem:[%s3596_s3 + $0x108] sm:$0xf] %vm1870_vm3, %v2328_v28  ;;  %v2265_v35 = vpack.c.bf16 %v1233_v29, %v1233_v29  ;;  %v2329_v36 = vpack.c.bf16 %v1297_v30, %v1297_v30 }
  0xe5   :  { %1871 = vst.msk [vmem:[%s3596_s3] sm:$0xf] %vm1870_vm3, %v2262_v31  ;;  %1935 = vst.msk [vmem:[%s3596_s3 + $0x100] sm:$0xf] %vm1870_vm3, %v2326_v32  ;;  %v2263_v37 = vpack.c.bf16 %v1231_v33, %v1231_v33  ;;  %v2327_v38 = vpack.c.bf16 %v1295_v34, %v1295_v34  ;;  %v2466_v39 = vpop.f32.mrb[4].mxu0  ;;  %v2530_v40 = vpop.f32.mrb[4].mxu1 }
  0xe6   :  { %1874 = vst.msk [vmem:[%s3596_s3 + $0xc] sm:$0xf] %vm1870_vm3, %v2265_v35  ;;  %1938 = vst.msk [vmem:[%s3596_s3 + $0x10c] sm:$0xf] %vm1870_vm3, %v2329_v36  ;;  %v744_v41 = vadd.f32 %v2466_v39, %v2946_v6  ;;  %v1000_v42 = vadd.f32 %v2530_v40, %v2946_v6  ;;  %v735_v43 = vpop.f32.mrb[5].mxu0  ;;  %v991_v44 = vpop.f32.mrb[5].mxu1 }
  0xe7   :  { %1872 = vst.msk [vmem:[%s3596_s3 + $0x4] sm:$0xf] %vm1870_vm3, %v2263_v37  ;;  %1936 = vst.msk [vmem:[%s3596_s3 + $0x104] sm:$0xf] %vm1870_vm3, %v2327_v38  ;;  %v736_v45 = vadd.f32 %v2946_v6, %v735_v43  ;;  %v992_v46 = vadd.f32 %v2946_v6, %v991_v44  ;;  %v2467_v47 = vpop.f32.mrb[6].mxu0  ;;  %v2531_v48 = vpop.f32.mrb[6].mxu1 }
  0xe8   :  { %v1236_v49 = vmax.f32 %v744_v41, 0.0  ;;  %v1300_v50 = vmax.f32 %v1000_v42, 0.0  ;;  %v747_v51 = vadd.f32 %v2467_v47, %v2946_v6  ;;  %v1003_v52 = vadd.f32 %v2531_v48, %v2946_v6  ;;  %v738_v53 = vpop.f32.mrb[7].mxu0  ;;  %v994_v54 = vpop.f32.mrb[7].mxu1 }
  0xe9   :  { %v1234_v55 = vmax.f32 %v736_v45, 0.0  ;;  %v1298_v56 = vmax.f32 %v992_v46, 0.0  ;;  %v739_v57 = vadd.f32 %v2946_v6, %v738_v53  ;;  %v995_v58 = vadd.f32 %v2946_v6, %v994_v54 }
  0xea   :  { %v2268_v59 = vpack.c.bf16 %v1236_v49, %v1236_v49  ;;  %v2332_v60 = vpack.c.bf16 %v1300_v50, %v1300_v50  ;;  %v1237_v61 = vmax.f32 %v747_v51, 0.0  ;;  %v1301_v62 = vmax.f32 %v1003_v52, 0.0 }
  0xeb   :  { %v2266_v63 = vpack.c.bf16 %v1234_v55, %v1234_v55  ;;  %v2330_v0 = vpack.c.bf16 %v1298_v56, %v1298_v56  ;;  %v1235_v1 = vmax.f32 %v739_v57, 0.0  ;;  %v1299_v2 = vmax.f32 %v995_v58, 0.0 }
  0xec   :  { %1877 = vst.msk [vmem:[%s3596_s3 + $0x18] sm:$0xf] %vm1870_vm3, %v2268_v59  ;;  %1941 = vst.msk [vmem:[%s3596_s3 + $0x118] sm:$0xf] %vm1870_vm3, %v2332_v60  ;;  %v2269_v3 = vpack.c.bf16 %v1237_v61, %v1237_v61  ;;  %v2333_v4 = vpack.c.bf16 %v1301_v62, %v1301_v62 }
  0xed   :  { %1875 = vst.msk [vmem:[%s3596_s3 + $0x10] sm:$0xf] %vm1870_vm3, %v2266_v63  ;;  %1939 = vst.msk [vmem:[%s3596_s3 + $0x110] sm:$0xf] %vm1870_vm3, %v2330_v0  ;;  %v2267_v5 = vpack.c.bf16 %v1235_v1, %v1235_v1  ;;  %v2331_v7 = vpack.c.bf16 %v1299_v2, %v1299_v2  ;;  %v2470_v8 = vpop.f32.mrb[8].mxu0  ;;  %v2534_v9 = vpop.f32.mrb[8].mxu1 }
  0xee   :  { %1878 = vst.msk [vmem:[%s3596_s3 + $0x1c] sm:$0xf] %vm1870_vm3, %v2269_v3  ;;  %1942 = vst.msk [vmem:[%s3596_s3 + $0x11c] sm:$0xf] %vm1870_vm3, %v2333_v4  ;;  %v760_v10 = vadd.f32 %v2470_v8, %v2946_v6  ;;  %v1016_v11 = vadd.f32 %v2534_v9, %v2946_v6  ;;  %v751_v12 = vpop.f32.mrb[9].mxu0  ;;  %v1007_v13 = vpop.f32.mrb[9].mxu1 }
  0xef   :  { %1876 = vst.msk [vmem:[%s3596_s3 + $0x14] sm:$0xf] %vm1870_vm3, %v2267_v5  ;;  %1940 = vst.msk [vmem:[%s3596_s3 + $0x114] sm:$0xf] %vm1870_vm3, %v2331_v7  ;;  %v752_v14 = vadd.f32 %v2946_v6, %v751_v12  ;;  %v1008_v15 = vadd.f32 %v2946_v6, %v1007_v13  ;;  %v2471_v16 = vpop.f32.mrb[10].mxu0  ;;  %v2535_v17 = vpop.f32.mrb[10].mxu1 }
  0xf0   :  { %v1240_v18 = vmax.f32 %v760_v10, 0.0  ;;  %v1304_v19 = vmax.f32 %v1016_v11, 0.0  ;;  %v763_v20 = vadd.f32 %v2471_v16, %v2946_v6  ;;  %v1019_v21 = vadd.f32 %v2535_v17, %v2946_v6  ;;  %v754_v22 = vpop.f32.mrb[11].mxu0  ;;  %v1010_v23 = vpop.f32.mrb[11].mxu1 }
  0xf1   :  { %v1238_v24 = vmax.f32 %v752_v14, 0.0  ;;  %v1302_v25 = vmax.f32 %v1008_v15, 0.0  ;;  %v755_v26 = vadd.f32 %v2946_v6, %v754_v22  ;;  %v1011_v27 = vadd.f32 %v2946_v6, %v1010_v23 }
  0xf2   :  { %v2272_v28 = vpack.c.bf16 %v1240_v18, %v1240_v18  ;;  %v2336_v29 = vpack.c.bf16 %v1304_v19, %v1304_v19  ;;  %v1241_v30 = vmax.f32 %v763_v20, 0.0  ;;  %v1305_v31 = vmax.f32 %v1019_v21, 0.0 }
  0xf3   :  { %v2270_v32 = vpack.c.bf16 %v1238_v24, %v1238_v24  ;;  %v2334_v33 = vpack.c.bf16 %v1302_v25, %v1302_v25  ;;  %v1239_v34 = vmax.f32 %v755_v26, 0.0  ;;  %v1303_v35 = vmax.f32 %v1011_v27, 0.0 }
  0xf4   :  { %1881 = vst.msk [vmem:[%s3596_s3 + $0x28] sm:$0xf] %vm1870_vm3, %v2272_v28  ;;  %1945 = vst.msk [vmem:[%s3596_s3 + $0x128] sm:$0xf] %vm1870_vm3, %v2336_v29  ;;  %v2273_v36 = vpack.c.bf16 %v1241_v30, %v1241_v30  ;;  %v2337_v37 = vpack.c.bf16 %v1305_v31, %v1305_v31 }
  0xf5   :  { %1879 = vst.msk [vmem:[%s3596_s3 + $0x20] sm:$0xf] %vm1870_vm3, %v2270_v32  ;;  %1943 = vst.msk [vmem:[%s3596_s3 + $0x120] sm:$0xf] %vm1870_vm3, %v2334_v33  ;;  %v2271_v38 = vpack.c.bf16 %v1239_v34, %v1239_v34  ;;  %v2335_v39 = vpack.c.bf16 %v1303_v35, %v1303_v35  ;;  %v2474_v40 = vpop.f32.mrb[12].mxu0  ;;  %v2538_v41 = vpop.f32.mrb[12].mxu1 }
  0xf6   :  { %1882 = vst.msk [vmem:[%s3596_s3 + $0x2c] sm:$0xf] %vm1870_vm3, %v2273_v36  ;;  %1946 = vst.msk [vmem:[%s3596_s3 + $0x12c] sm:$0xf] %vm1870_vm3, %v2337_v37  ;;  %v776_v42 = vadd.f32 %v2474_v40, %v2946_v6  ;;  %v1032_v43 = vadd.f32 %v2538_v41, %v2946_v6  ;;  %v767_v44 = vpop.f32.mrb[13].mxu0  ;;  %v1023_v45 = vpop.f32.mrb[13].mxu1 }
  0xf7   :  { %1880 = vst.msk [vmem:[%s3596_s3 + $0x24] sm:$0xf] %vm1870_vm3, %v2271_v38  ;;  %1944 = vst.msk [vmem:[%s3596_s3 + $0x124] sm:$0xf] %vm1870_vm3, %v2335_v39  ;;  %v768_v46 = vadd.f32 %v2946_v6, %v767_v44  ;;  %v1024_v47 = vadd.f32 %v2946_v6, %v1023_v45  ;;  %v2475_v48 = vpop.f32.mrb[14].mxu0  ;;  %v2539_v49 = vpop.f32.mrb[14].mxu1 }
  0xf8   :  { %v1244_v50 = vmax.f32 %v776_v42, 0.0  ;;  %v1308_v51 = vmax.f32 %v1032_v43, 0.0  ;;  %v779_v52 = vadd.f32 %v2475_v48, %v2946_v6  ;;  %v1035_v53 = vadd.f32 %v2539_v49, %v2946_v6  ;;  %v770_v54 = vpop.f32.mrb[15].mxu0  ;;  %v1026_v55 = vpop.f32.mrb[15].mxu1 }
  0xf9   :  { %v1242_v56 = vmax.f32 %v768_v46, 0.0  ;;  %v1306_v57 = vmax.f32 %v1024_v47, 0.0  ;;  %v771_v58 = vadd.f32 %v2946_v6, %v770_v54  ;;  %v1027_v59 = vadd.f32 %v2946_v6, %v1026_v55 }
  0xfa   :  { %v2276_v60 = vpack.c.bf16 %v1244_v50, %v1244_v50  ;;  %v2340_v61 = vpack.c.bf16 %v1308_v51, %v1308_v51  ;;  %v1245_v62 = vmax.f32 %v779_v52, 0.0  ;;  %v1309_v63 = vmax.f32 %v1035_v53, 0.0 }
  0xfb   :  { %v2274_v0 = vpack.c.bf16 %v1242_v56, %v1242_v56  ;;  %v2338_v1 = vpack.c.bf16 %v1306_v57, %v1306_v57  ;;  %v1243_v2 = vmax.f32 %v771_v58, 0.0  ;;  %v1307_v3 = vmax.f32 %v1027_v59, 0.0 }
  0xfc   :  { %1885 = vst.msk [vmem:[%s3596_s3 + $0x38] sm:$0xf] %vm1870_vm3, %v2276_v60  ;;  %1949 = vst.msk [vmem:[%s3596_s3 + $0x138] sm:$0xf] %vm1870_vm3, %v2340_v61  ;;  %v2277_v4 = vpack.c.bf16 %v1245_v62, %v1245_v62  ;;  %v2341_v5 = vpack.c.bf16 %v1309_v63, %v1309_v63 }
  0xfd   :  { %1883 = vst.msk [vmem:[%s3596_s3 + $0x30] sm:$0xf] %vm1870_vm3, %v2274_v0  ;;  %1947 = vst.msk [vmem:[%s3596_s3 + $0x130] sm:$0xf] %vm1870_vm3, %v2338_v1  ;;  %v2275_v7 = vpack.c.bf16 %v1243_v2, %v1243_v2  ;;  %v2339_v8 = vpack.c.bf16 %v1307_v3, %v1307_v3  ;;  %v2478_v9 = vpop.f32.mrb[16].mxu0  ;;  %v2542_v10 = vpop.f32.mrb[16].mxu1 }
  0xfe   :  { %1886 = vst.msk [vmem:[%s3596_s3 + $0x3c] sm:$0xf] %vm1870_vm3, %v2277_v4  ;;  %1950 = vst.msk [vmem:[%s3596_s3 + $0x13c] sm:$0xf] %vm1870_vm3, %v2341_v5  ;;  %v792_v11 = vadd.f32 %v2478_v9, %v2946_v6  ;;  %v1048_v12 = vadd.f32 %v2542_v10, %v2946_v6  ;;  %v783_v13 = vpop.f32.mrb[17].mxu0  ;;  %v1039_v14 = vpop.f32.mrb[17].mxu1 }
  0xff   :  { %1884 = vst.msk [vmem:[%s3596_s3 + $0x34] sm:$0xf] %vm1870_vm3, %v2275_v7  ;;  %1948 = vst.msk [vmem:[%s3596_s3 + $0x134] sm:$0xf] %vm1870_vm3, %v2339_v8  ;;  %v784_v15 = vadd.f32 %v2946_v6, %v783_v13  ;;  %v1040_v16 = vadd.f32 %v2946_v6, %v1039_v14  ;;  %v2479_v17 = vpop.f32.mrb[18].mxu0  ;;  %v2543_v18 = vpop.f32.mrb[18].mxu1 }
 0x100   :  { %v1248_v19 = vmax.f32 %v792_v11, 0.0  ;;  %v1312_v20 = vmax.f32 %v1048_v12, 0.0  ;;  %v795_v21 = vadd.f32 %v2479_v17, %v2946_v6  ;;  %v1051_v22 = vadd.f32 %v2543_v18, %v2946_v6  ;;  %v786_v23 = vpop.f32.mrb[19].mxu0  ;;  %v1042_v24 = vpop.f32.mrb[19].mxu1 }
 0x101   :  { %v1246_v25 = vmax.f32 %v784_v15, 0.0  ;;  %v1310_v26 = vmax.f32 %v1040_v16, 0.0  ;;  %v787_v27 = vadd.f32 %v2946_v6, %v786_v23  ;;  %v1043_v28 = vadd.f32 %v2946_v6, %v1042_v24 }
 0x102   :  { %v2280_v29 = vpack.c.bf16 %v1248_v19, %v1248_v19  ;;  %v2344_v30 = vpack.c.bf16 %v1312_v20, %v1312_v20  ;;  %v1249_v31 = vmax.f32 %v795_v21, 0.0  ;;  %v1313_v32 = vmax.f32 %v1051_v22, 0.0 }
 0x103   :  { %v2278_v33 = vpack.c.bf16 %v1246_v25, %v1246_v25  ;;  %v2342_v34 = vpack.c.bf16 %v1310_v26, %v1310_v26  ;;  %v1247_v35 = vmax.f32 %v787_v27, 0.0  ;;  %v1311_v36 = vmax.f32 %v1043_v28, 0.0 }
 0x104   :  { %1889 = vst.msk [vmem:[%s3596_s3 + $0x48] sm:$0xf] %vm1870_vm3, %v2280_v29  ;;  %1953 = vst.msk [vmem:[%s3596_s3 + $0x148] sm:$0xf] %vm1870_vm3, %v2344_v30  ;;  %v2281_v37 = vpack.c.bf16 %v1249_v31, %v1249_v31  ;;  %v2345_v38 = vpack.c.bf16 %v1313_v32, %v1313_v32 }
 0x105   :  { %1887 = vst.msk [vmem:[%s3596_s3 + $0x40] sm:$0xf] %vm1870_vm3, %v2278_v33  ;;  %1951 = vst.msk [vmem:[%s3596_s3 + $0x140] sm:$0xf] %vm1870_vm3, %v2342_v34  ;;  %v2279_v39 = vpack.c.bf16 %v1247_v35, %v1247_v35  ;;  %v2343_v40 = vpack.c.bf16 %v1311_v36, %v1311_v36  ;;  %v2482_v41 = vpop.f32.mrb[20].mxu0  ;;  %v2546_v42 = vpop.f32.mrb[20].mxu1 }
 0x106   :  { %1890 = vst.msk [vmem:[%s3596_s3 + $0x4c] sm:$0xf] %vm1870_vm3, %v2281_v37  ;;  %1954 = vst.msk [vmem:[%s3596_s3 + $0x14c] sm:$0xf] %vm1870_vm3, %v2345_v38  ;;  %v808_v43 = vadd.f32 %v2482_v41, %v2946_v6  ;;  %v1064_v44 = vadd.f32 %v2546_v42, %v2946_v6  ;;  %v799_v45 = vpop.f32.mrb[21].mxu0  ;;  %v1055_v46 = vpop.f32.mrb[21].mxu1 }
 0x107   :  { %1888 = vst.msk [vmem:[%s3596_s3 + $0x44] sm:$0xf] %vm1870_vm3, %v2279_v39  ;;  %1952 = vst.msk [vmem:[%s3596_s3 + $0x144] sm:$0xf] %vm1870_vm3, %v2343_v40  ;;  %v800_v47 = vadd.f32 %v2946_v6, %v799_v45  ;;  %v1056_v48 = vadd.f32 %v2946_v6, %v1055_v46  ;;  %v2483_v49 = vpop.f32.mrb[22].mxu0  ;;  %v2547_v50 = vpop.f32.mrb[22].mxu1 }
 0x108   :  { %v1252_v51 = vmax.f32 %v808_v43, 0.0  ;;  %v1316_v52 = vmax.f32 %v1064_v44, 0.0  ;;  %v811_v53 = vadd.f32 %v2483_v49, %v2946_v6  ;;  %v1067_v54 = vadd.f32 %v2547_v50, %v2946_v6  ;;  %v802_v55 = vpop.f32.mrb[23].mxu0  ;;  %v1058_v56 = vpop.f32.mrb[23].mxu1 }
 0x109   :  { %v1250_v57 = vmax.f32 %v800_v47, 0.0  ;;  %v1314_v58 = vmax.f32 %v1056_v48, 0.0  ;;  %v803_v59 = vadd.f32 %v2946_v6, %v802_v55  ;;  %v1059_v60 = vadd.f32 %v2946_v6, %v1058_v56 }
 0x10a   :  { %v2284_v61 = vpack.c.bf16 %v1252_v51, %v1252_v51  ;;  %v2348_v62 = vpack.c.bf16 %v1316_v52, %v1316_v52  ;;  %v1253_v63 = vmax.f32 %v811_v53, 0.0  ;;  %v1317_v0 = vmax.f32 %v1067_v54, 0.0 }
 0x10b   :  { %v2282_v1 = vpack.c.bf16 %v1250_v57, %v1250_v57  ;;  %v2346_v2 = vpack.c.bf16 %v1314_v58, %v1314_v58  ;;  %v1251_v3 = vmax.f32 %v803_v59, 0.0  ;;  %v1315_v4 = vmax.f32 %v1059_v60, 0.0 }
 0x10c   :  { %1893 = vst.msk [vmem:[%s3596_s3 + $0x58] sm:$0xf] %vm1870_vm3, %v2284_v61  ;;  %1957 = vst.msk [vmem:[%s3596_s3 + $0x158] sm:$0xf] %vm1870_vm3, %v2348_v62  ;;  %v2285_v5 = vpack.c.bf16 %v1253_v63, %v1253_v63  ;;  %v2349_v7 = vpack.c.bf16 %v1317_v0, %v1317_v0 }
 0x10d   :  { %1891 = vst.msk [vmem:[%s3596_s3 + $0x50] sm:$0xf] %vm1870_vm3, %v2282_v1  ;;  %1955 = vst.msk [vmem:[%s3596_s3 + $0x150] sm:$0xf] %vm1870_vm3, %v2346_v2  ;;  %v2283_v8 = vpack.c.bf16 %v1251_v3, %v1251_v3  ;;  %v2347_v9 = vpack.c.bf16 %v1315_v4, %v1315_v4  ;;  %v2486_v10 = vpop.f32.mrb[24].mxu0  ;;  %v2550_v11 = vpop.f32.mrb[24].mxu1 }
 0x10e   :  { %1894 = vst.msk [vmem:[%s3596_s3 + $0x5c] sm:$0xf] %vm1870_vm3, %v2285_v5  ;;  %1958 = vst.msk [vmem:[%s3596_s3 + $0x15c] sm:$0xf] %vm1870_vm3, %v2349_v7  ;;  %v824_v12 = vadd.f32 %v2486_v10, %v2946_v6  ;;  %v1080_v13 = vadd.f32 %v2550_v11, %v2946_v6  ;;  %v815_v14 = vpop.f32.mrb[25].mxu0  ;;  %v1071_v15 = vpop.f32.mrb[25].mxu1 }
 0x10f   :  { %1892 = vst.msk [vmem:[%s3596_s3 + $0x54] sm:$0xf] %vm1870_vm3, %v2283_v8  ;;  %1956 = vst.msk [vmem:[%s3596_s3 + $0x154] sm:$0xf] %vm1870_vm3, %v2347_v9  ;;  %v816_v16 = vadd.f32 %v2946_v6, %v815_v14  ;;  %v1072_v17 = vadd.f32 %v2946_v6, %v1071_v15  ;;  %v2487_v18 = vpop.f32.mrb[26].mxu0  ;;  %v2551_v19 = vpop.f32.mrb[26].mxu1 }
 0x110   :  { %v1256_v20 = vmax.f32 %v824_v12, 0.0  ;;  %v1320_v21 = vmax.f32 %v1080_v13, 0.0  ;;  %v827_v22 = vadd.f32 %v2487_v18, %v2946_v6  ;;  %v1083_v23 = vadd.f32 %v2551_v19, %v2946_v6  ;;  %v818_v24 = vpop.f32.mrb[27].mxu0  ;;  %v1074_v25 = vpop.f32.mrb[27].mxu1 }
 0x111   :  { %v1254_v26 = vmax.f32 %v816_v16, 0.0  ;;  %v1318_v27 = vmax.f32 %v1072_v17, 0.0  ;;  %v819_v28 = vadd.f32 %v2946_v6, %v818_v24  ;;  %v1075_v29 = vadd.f32 %v2946_v6, %v1074_v25 }
 0x112   :  { %v2288_v30 = vpack.c.bf16 %v1256_v20, %v1256_v20  ;;  %v2352_v31 = vpack.c.bf16 %v1320_v21, %v1320_v21  ;;  %v1257_v32 = vmax.f32 %v827_v22, 0.0  ;;  %v1321_v33 = vmax.f32 %v1083_v23, 0.0 }
 0x113   :  { %v2286_v34 = vpack.c.bf16 %v1254_v26, %v1254_v26  ;;  %v2350_v35 = vpack.c.bf16 %v1318_v27, %v1318_v27  ;;  %v1255_v36 = vmax.f32 %v819_v28, 0.0  ;;  %v1319_v37 = vmax.f32 %v1075_v29, 0.0 }
 0x114   :  { %1897 = vst.msk [vmem:[%s3596_s3 + $0x68] sm:$0xf] %vm1870_vm3, %v2288_v30  ;;  %1961 = vst.msk [vmem:[%s3596_s3 + $0x168] sm:$0xf] %vm1870_vm3, %v2352_v31  ;;  %v2289_v38 = vpack.c.bf16 %v1257_v32, %v1257_v32  ;;  %v2353_v39 = vpack.c.bf16 %v1321_v33, %v1321_v33 }
 0x115   :  { %1895 = vst.msk [vmem:[%s3596_s3 + $0x60] sm:$0xf] %vm1870_vm3, %v2286_v34  ;;  %1959 = vst.msk [vmem:[%s3596_s3 + $0x160] sm:$0xf] %vm1870_vm3, %v2350_v35  ;;  %v2287_v40 = vpack.c.bf16 %v1255_v36, %v1255_v36  ;;  %v2351_v41 = vpack.c.bf16 %v1319_v37, %v1319_v37  ;;  %v2490_v42 = vpop.f32.mrb[28].mxu0  ;;  %v2554_v43 = vpop.f32.mrb[28].mxu1 }
 0x116   :  { %1898 = vst.msk [vmem:[%s3596_s3 + $0x6c] sm:$0xf] %vm1870_vm3, %v2289_v38  ;;  %1962 = vst.msk [vmem:[%s3596_s3 + $0x16c] sm:$0xf] %vm1870_vm3, %v2353_v39  ;;  %v840_v44 = vadd.f32 %v2490_v42, %v2946_v6  ;;  %v1096_v45 = vadd.f32 %v2554_v43, %v2946_v6  ;;  %v831_v46 = vpop.f32.mrb[29].mxu0  ;;  %v1087_v47 = vpop.f32.mrb[29].mxu1 }
 0x117   :  { %1896 = vst.msk [vmem:[%s3596_s3 + $0x64] sm:$0xf] %vm1870_vm3, %v2287_v40  ;;  %1960 = vst.msk [vmem:[%s3596_s3 + $0x164] sm:$0xf] %vm1870_vm3, %v2351_v41  ;;  %v832_v48 = vadd.f32 %v2946_v6, %v831_v46  ;;  %v1088_v49 = vadd.f32 %v2946_v6, %v1087_v47  ;;  %v2491_v50 = vpop.f32.mrb[30].mxu0  ;;  %v2555_v51 = vpop.f32.mrb[30].mxu1 }
 0x118   :  { %v1260_v52 = vmax.f32 %v840_v44, 0.0  ;;  %v1324_v53 = vmax.f32 %v1096_v45, 0.0  ;;  %v843_v54 = vadd.f32 %v2491_v50, %v2946_v6  ;;  %v1099_v55 = vadd.f32 %v2555_v51, %v2946_v6  ;;  %v834_v56 = vpop.f32.mrb[31].mxu0  ;;  %v1090_v57 = vpop.f32.mrb[31].mxu1 }
 0x119   :  { %v1258_v58 = vmax.f32 %v832_v48, 0.0  ;;  %v1322_v59 = vmax.f32 %v1088_v49, 0.0  ;;  %v835_v60 = vadd.f32 %v2946_v6, %v834_v56  ;;  %v1091_v61 = vadd.f32 %v2946_v6, %v1090_v57 }
 0x11a   :  { %v2292_v62 = vpack.c.bf16 %v1260_v52, %v1260_v52  ;;  %v2356_v63 = vpack.c.bf16 %v1324_v53, %v1324_v53  ;;  %v1261_v0 = vmax.f32 %v843_v54, 0.0  ;;  %v1325_v1 = vmax.f32 %v1099_v55, 0.0 }
 0x11b   :  { %v2290_v2 = vpack.c.bf16 %v1258_v58, %v1258_v58  ;;  %v2354_v3 = vpack.c.bf16 %v1322_v59, %v1322_v59  ;;  %v1259_v4 = vmax.f32 %v835_v60, 0.0  ;;  %v1323_v5 = vmax.f32 %v1091_v61, 0.0 }
 0x11c   :  { %1901 = vst.msk [vmem:[%s3596_s3 + $0x78] sm:$0xf] %vm1870_vm3, %v2292_v62  ;;  %1965 = vst.msk [vmem:[%s3596_s3 + $0x178] sm:$0xf] %vm1870_vm3, %v2356_v63  ;;  %v2293_v7 = vpack.c.bf16 %v1261_v0, %v1261_v0  ;;  %v2357_v8 = vpack.c.bf16 %v1325_v1, %v1325_v1 }
 0x11d   :  { %1899 = vst.msk [vmem:[%s3596_s3 + $0x70] sm:$0xf] %vm1870_vm3, %v2290_v2  ;;  %1963 = vst.msk [vmem:[%s3596_s3 + $0x170] sm:$0xf] %vm1870_vm3, %v2354_v3  ;;  %v2291_v9 = vpack.c.bf16 %v1259_v4, %v1259_v4  ;;  %v2355_v10 = vpack.c.bf16 %v1323_v5, %v1323_v5  ;;  %v2494_v11 = vpop.f32.mrb[32].mxu0  ;;  %v2558_v12 = vpop.f32.mrb[32].mxu1 }
 0x11e   :  { %1902 = vst.msk [vmem:[%s3596_s3 + $0x7c] sm:$0xf] %vm1870_vm3, %v2293_v7  ;;  %1966 = vst.msk [vmem:[%s3596_s3 + $0x17c] sm:$0xf] %vm1870_vm3, %v2357_v8  ;;  %v856_v13 = vadd.f32 %v2494_v11, %v2946_v6  ;;  %v1112_v14 = vadd.f32 %v2558_v12, %v2946_v6  ;;  %v847_v15 = vpop.f32.mrb[33].mxu0  ;;  %v1103_v16 = vpop.f32.mrb[33].mxu1 }
 0x11f   :  { %1900 = vst.msk [vmem:[%s3596_s3 + $0x74] sm:$0xf] %vm1870_vm3, %v2291_v9  ;;  %1964 = vst.msk [vmem:[%s3596_s3 + $0x174] sm:$0xf] %vm1870_vm3, %v2355_v10  ;;  %v848_v17 = vadd.f32 %v2946_v6, %v847_v15  ;;  %v1104_v18 = vadd.f32 %v2946_v6, %v1103_v16  ;;  %v2495_v19 = vpop.f32.mrb[34].mxu0  ;;  %v2559_v20 = vpop.f32.mrb[34].mxu1 }
 0x120   :  { %v1264_v21 = vmax.f32 %v856_v13, 0.0  ;;  %v1328_v22 = vmax.f32 %v1112_v14, 0.0  ;;  %v859_v23 = vadd.f32 %v2495_v19, %v2946_v6  ;;  %v1115_v24 = vadd.f32 %v2559_v20, %v2946_v6  ;;  %v850_v25 = vpop.f32.mrb[35].mxu0  ;;  %v1106_v26 = vpop.f32.mrb[35].mxu1 }
 0x121   :  { %v1262_v27 = vmax.f32 %v848_v17, 0.0  ;;  %v1326_v28 = vmax.f32 %v1104_v18, 0.0  ;;  %v851_v29 = vadd.f32 %v2946_v6, %v850_v25  ;;  %v1107_v30 = vadd.f32 %v2946_v6, %v1106_v26 }
 0x122   :  { %v2296_v31 = vpack.c.bf16 %v1264_v21, %v1264_v21  ;;  %v2360_v32 = vpack.c.bf16 %v1328_v22, %v1328_v22  ;;  %v1265_v33 = vmax.f32 %v859_v23, 0.0  ;;  %v1329_v34 = vmax.f32 %v1115_v24, 0.0 }
 0x123   :  { %v2294_v35 = vpack.c.bf16 %v1262_v27, %v1262_v27  ;;  %v2358_v36 = vpack.c.bf16 %v1326_v28, %v1326_v28  ;;  %v1263_v37 = vmax.f32 %v851_v29, 0.0  ;;  %v1327_v38 = vmax.f32 %v1107_v30, 0.0 }
 0x124   :  { %1905 = vst.msk [vmem:[%s3596_s3 + $0x88] sm:$0xf] %vm1870_vm3, %v2296_v31  ;;  %1969 = vst.msk [vmem:[%s3596_s3 + $0x188] sm:$0xf] %vm1870_vm3, %v2360_v32  ;;  %v2297_v39 = vpack.c.bf16 %v1265_v33, %v1265_v33  ;;  %v2361_v40 = vpack.c.bf16 %v1329_v34, %v1329_v34 }
 0x125   :  { %1903 = vst.msk [vmem:[%s3596_s3 + $0x80] sm:$0xf] %vm1870_vm3, %v2294_v35  ;;  %1967 = vst.msk [vmem:[%s3596_s3 + $0x180] sm:$0xf] %vm1870_vm3, %v2358_v36  ;;  %v2295_v41 = vpack.c.bf16 %v1263_v37, %v1263_v37  ;;  %v2359_v42 = vpack.c.bf16 %v1327_v38, %v1327_v38  ;;  %v2498_v43 = vpop.f32.mrb[36].mxu0  ;;  %v2562_v44 = vpop.f32.mrb[36].mxu1 }
 0x126   :  { %1906 = vst.msk [vmem:[%s3596_s3 + $0x8c] sm:$0xf] %vm1870_vm3, %v2297_v39  ;;  %1970 = vst.msk [vmem:[%s3596_s3 + $0x18c] sm:$0xf] %vm1870_vm3, %v2361_v40  ;;  %v872_v45 = vadd.f32 %v2498_v43, %v2946_v6  ;;  %v1128_v46 = vadd.f32 %v2562_v44, %v2946_v6  ;;  %v863_v47 = vpop.f32.mrb[37].mxu0  ;;  %v1119_v48 = vpop.f32.mrb[37].mxu1 }
 0x127   :  { %1904 = vst.msk [vmem:[%s3596_s3 + $0x84] sm:$0xf] %vm1870_vm3, %v2295_v41  ;;  %1968 = vst.msk [vmem:[%s3596_s3 + $0x184] sm:$0xf] %vm1870_vm3, %v2359_v42  ;;  %v864_v49 = vadd.f32 %v2946_v6, %v863_v47  ;;  %v1120_v50 = vadd.f32 %v2946_v6, %v1119_v48  ;;  %v2499_v51 = vpop.f32.mrb[38].mxu0  ;;  %v2563_v52 = vpop.f32.mrb[38].mxu1 }
 0x128   :  { %v1268_v53 = vmax.f32 %v872_v45, 0.0  ;;  %v1332_v54 = vmax.f32 %v1128_v46, 0.0  ;;  %v875_v55 = vadd.f32 %v2499_v51, %v2946_v6  ;;  %v1131_v56 = vadd.f32 %v2563_v52, %v2946_v6  ;;  %v866_v57 = vpop.f32.mrb[39].mxu0  ;;  %v1122_v58 = vpop.f32.mrb[39].mxu1 }
 0x129   :  { %v1266_v59 = vmax.f32 %v864_v49, 0.0  ;;  %v1330_v60 = vmax.f32 %v1120_v50, 0.0  ;;  %v867_v61 = vadd.f32 %v2946_v6, %v866_v57  ;;  %v1123_v62 = vadd.f32 %v2946_v6, %v1122_v58 }
 0x12a   :  { %v2300_v63 = vpack.c.bf16 %v1268_v53, %v1268_v53  ;;  %v2364_v0 = vpack.c.bf16 %v1332_v54, %v1332_v54  ;;  %v1269_v1 = vmax.f32 %v875_v55, 0.0  ;;  %v1333_v2 = vmax.f32 %v1131_v56, 0.0 }
 0x12b   :  { %v2298_v3 = vpack.c.bf16 %v1266_v59, %v1266_v59  ;;  %v2362_v4 = vpack.c.bf16 %v1330_v60, %v1330_v60  ;;  %v1267_v5 = vmax.f32 %v867_v61, 0.0  ;;  %v1331_v7 = vmax.f32 %v1123_v62, 0.0 }
 0x12c   :  { %1909 = vst.msk [vmem:[%s3596_s3 + $0x98] sm:$0xf] %vm1870_vm3, %v2300_v63  ;;  %1973 = vst.msk [vmem:[%s3596_s3 + $0x198] sm:$0xf] %vm1870_vm3, %v2364_v0  ;;  %v2301_v8 = vpack.c.bf16 %v1269_v1, %v1269_v1  ;;  %v2365_v9 = vpack.c.bf16 %v1333_v2, %v1333_v2 }
 0x12d   :  { %1907 = vst.msk [vmem:[%s3596_s3 + $0x90] sm:$0xf] %vm1870_vm3, %v2298_v3  ;;  %1971 = vst.msk [vmem:[%s3596_s3 + $0x190] sm:$0xf] %vm1870_vm3, %v2362_v4  ;;  %v2299_v10 = vpack.c.bf16 %v1267_v5, %v1267_v5  ;;  %v2363_v11 = vpack.c.bf16 %v1331_v7, %v1331_v7  ;;  %v2502_v12 = vpop.f32.mrb[40].mxu0  ;;  %v2566_v13 = vpop.f32.mrb[40].mxu1 }
 0x12e   :  { %1910 = vst.msk [vmem:[%s3596_s3 + $0x9c] sm:$0xf] %vm1870_vm3, %v2301_v8  ;;  %1974 = vst.msk [vmem:[%s3596_s3 + $0x19c] sm:$0xf] %vm1870_vm3, %v2365_v9  ;;  %v888_v14 = vadd.f32 %v2502_v12, %v2946_v6  ;;  %v1144_v15 = vadd.f32 %v2566_v13, %v2946_v6  ;;  %v879_v16 = vpop.f32.mrb[41].mxu0  ;;  %v1135_v17 = vpop.f32.mrb[41].mxu1 }
 0x12f   :  { %1908 = vst.msk [vmem:[%s3596_s3 + $0x94] sm:$0xf] %vm1870_vm3, %v2299_v10  ;;  %1972 = vst.msk [vmem:[%s3596_s3 + $0x194] sm:$0xf] %vm1870_vm3, %v2363_v11  ;;  %v880_v18 = vadd.f32 %v2946_v6, %v879_v16  ;;  %v1136_v19 = vadd.f32 %v2946_v6, %v1135_v17  ;;  %v2503_v20 = vpop.f32.mrb[42].mxu0  ;;  %v2567_v21 = vpop.f32.mrb[42].mxu1 }
 0x130   :  { %v1272_v22 = vmax.f32 %v888_v14, 0.0  ;;  %v1336_v23 = vmax.f32 %v1144_v15, 0.0  ;;  %v891_v24 = vadd.f32 %v2503_v20, %v2946_v6  ;;  %v1147_v25 = vadd.f32 %v2567_v21, %v2946_v6  ;;  %v882_v26 = vpop.f32.mrb[43].mxu0  ;;  %v1138_v27 = vpop.f32.mrb[43].mxu1 }
 0x131   :  { %v1270_v28 = vmax.f32 %v880_v18, 0.0  ;;  %v1334_v29 = vmax.f32 %v1136_v19, 0.0  ;;  %v883_v30 = vadd.f32 %v2946_v6, %v882_v26  ;;  %v1139_v31 = vadd.f32 %v2946_v6, %v1138_v27 }
 0x132   :  { %v2304_v32 = vpack.c.bf16 %v1272_v22, %v1272_v22  ;;  %v2368_v33 = vpack.c.bf16 %v1336_v23, %v1336_v23  ;;  %v1273_v34 = vmax.f32 %v891_v24, 0.0  ;;  %v1337_v35 = vmax.f32 %v1147_v25, 0.0 }
 0x133   :  { %v2302_v36 = vpack.c.bf16 %v1270_v28, %v1270_v28  ;;  %v2366_v37 = vpack.c.bf16 %v1334_v29, %v1334_v29  ;;  %v1271_v38 = vmax.f32 %v883_v30, 0.0  ;;  %v1335_v39 = vmax.f32 %v1139_v31, 0.0 }
 0x134   :  { %1913 = vst.msk [vmem:[%s3596_s3 + $0xa8] sm:$0xf] %vm1870_vm3, %v2304_v32  ;;  %1977 = vst.msk [vmem:[%s3596_s3 + $0x1a8] sm:$0xf] %vm1870_vm3, %v2368_v33  ;;  %v2305_v40 = vpack.c.bf16 %v1273_v34, %v1273_v34  ;;  %v2369_v41 = vpack.c.bf16 %v1337_v35, %v1337_v35 }
 0x135   :  { %1911 = vst.msk [vmem:[%s3596_s3 + $0xa0] sm:$0xf] %vm1870_vm3, %v2302_v36  ;;  %1975 = vst.msk [vmem:[%s3596_s3 + $0x1a0] sm:$0xf] %vm1870_vm3, %v2366_v37  ;;  %v2303_v42 = vpack.c.bf16 %v1271_v38, %v1271_v38  ;;  %v2367_v43 = vpack.c.bf16 %v1335_v39, %v1335_v39  ;;  %v2506_v44 = vpop.f32.mrb[44].mxu0  ;;  %v2570_v45 = vpop.f32.mrb[44].mxu1 }
 0x136   :  { %1914 = vst.msk [vmem:[%s3596_s3 + $0xac] sm:$0xf] %vm1870_vm3, %v2305_v40  ;;  %1978 = vst.msk [vmem:[%s3596_s3 + $0x1ac] sm:$0xf] %vm1870_vm3, %v2369_v41  ;;  %v904_v46 = vadd.f32 %v2506_v44, %v2946_v6  ;;  %v1160_v47 = vadd.f32 %v2570_v45, %v2946_v6  ;;  %v895_v48 = vpop.f32.mrb[45].mxu0  ;;  %v1151_v49 = vpop.f32.mrb[45].mxu1 }
 0x137   :  { %1912 = vst.msk [vmem:[%s3596_s3 + $0xa4] sm:$0xf] %vm1870_vm3, %v2303_v42  ;;  %1976 = vst.msk [vmem:[%s3596_s3 + $0x1a4] sm:$0xf] %vm1870_vm3, %v2367_v43  ;;  %v896_v50 = vadd.f32 %v2946_v6, %v895_v48  ;;  %v1152_v51 = vadd.f32 %v2946_v6, %v1151_v49  ;;  %v2507_v52 = vpop.f32.mrb[46].mxu0  ;;  %v2571_v53 = vpop.f32.mrb[46].mxu1 }
 0x138   :  { %v1276_v54 = vmax.f32 %v904_v46, 0.0  ;;  %v1340_v55 = vmax.f32 %v1160_v47, 0.0  ;;  %v907_v56 = vadd.f32 %v2507_v52, %v2946_v6  ;;  %v1163_v57 = vadd.f32 %v2571_v53, %v2946_v6  ;;  %v898_v58 = vpop.f32.mrb[47].mxu0  ;;  %v1154_v59 = vpop.f32.mrb[47].mxu1  ;;  %v3463_v46 = vld [vmem:[%s3595_s2] ss:$0 sm:$0xff] }
 0x139   :  { %v1274_v60 = vmax.f32 %v896_v50, 0.0  ;;  %v1338_v61 = vmax.f32 %v1152_v51, 0.0  ;;  %v899_v62 = vadd.f32 %v2946_v6, %v898_v58  ;;  %v1155_v63 = vadd.f32 %v2946_v6, %v1154_v59 }
 0x13a   :  { %v2308_v0 = vpack.c.bf16 %v1276_v54, %v1276_v54  ;;  %v2372_v1 = vpack.c.bf16 %v1340_v55, %v1340_v55  ;;  %v1277_v2 = vmax.f32 %v907_v56, 0.0  ;;  %v1341_v3 = vmax.f32 %v1163_v57, 0.0 }
 0x13b   :  { %v2306_v4 = vpack.c.bf16 %v1274_v60, %v1274_v60  ;;  %v2370_v5 = vpack.c.bf16 %v1338_v61, %v1338_v61  ;;  %v1275_v7 = vmax.f32 %v899_v62, 0.0  ;;  %v1339_v8 = vmax.f32 %v1155_v63, 0.0 }
 0x13c   :  { %1917 = vst.msk [vmem:[%s3596_s3 + $0xb8] sm:$0xf] %vm1870_vm3, %v2308_v0  ;;  %1981 = vst.msk [vmem:[%s3596_s3 + $0x1b8] sm:$0xf] %vm1870_vm3, %v2372_v1  ;;  %v2309_v9 = vpack.c.bf16 %v1277_v2, %v1277_v2  ;;  %v2373_v10 = vpack.c.bf16 %v1341_v3, %v1341_v3 }
 0x13d   :  { %1915 = vst.msk [vmem:[%s3596_s3 + $0xb0] sm:$0xf] %vm1870_vm3, %v2306_v4  ;;  %1979 = vst.msk [vmem:[%s3596_s3 + $0x1b0] sm:$0xf] %vm1870_vm3, %v2370_v5  ;;  %v2307_v11 = vpack.c.bf16 %v1275_v7, %v1275_v7  ;;  %v2371_v12 = vpack.c.bf16 %v1339_v8, %v1339_v8  ;;  %v2510_v13 = vpop.f32.mrb[48].mxu0  ;;  %v2574_v14 = vpop.f32.mrb[48].mxu1 }
 0x13e   :  { %1918 = vst.msk [vmem:[%s3596_s3 + $0xbc] sm:$0xf] %vm1870_vm3, %v2309_v9  ;;  %1982 = vst.msk [vmem:[%s3596_s3 + $0x1bc] sm:$0xf] %vm1870_vm3, %v2373_v10  ;;  %v920_v15 = vadd.f32 %v2510_v13, %v2946_v6  ;;  %v1176_v16 = vadd.f32 %v2574_v14, %v2946_v6  ;;  %v911_v17 = vpop.f32.mrb[49].mxu0  ;;  %v1167_v18 = vpop.f32.mrb[49].mxu1 }
 0x13f   :  { %1916 = vst.msk [vmem:[%s3596_s3 + $0xb4] sm:$0xf] %vm1870_vm3, %v2307_v11  ;;  %1980 = vst.msk [vmem:[%s3596_s3 + $0x1b4] sm:$0xf] %vm1870_vm3, %v2371_v12  ;;  %v912_v19 = vadd.f32 %v2946_v6, %v911_v17  ;;  %v1168_v20 = vadd.f32 %v2946_v6, %v1167_v18  ;;  %v2511_v21 = vpop.f32.mrb[50].mxu0  ;;  %v2575_v22 = vpop.f32.mrb[50].mxu1 }
 0x140   :  { %v1280_v23 = vmax.f32 %v920_v15, 0.0  ;;  %v1344_v24 = vmax.f32 %v1176_v16, 0.0  ;;  %v923_v25 = vadd.f32 %v2511_v21, %v2946_v6  ;;  %v1179_v26 = vadd.f32 %v2575_v22, %v2946_v6  ;;  %v914_v27 = vpop.f32.mrb[51].mxu0  ;;  %v1170_v28 = vpop.f32.mrb[51].mxu1 }
 0x141   :  { %v1278_v29 = vmax.f32 %v912_v19, 0.0  ;;  %v1342_v30 = vmax.f32 %v1168_v20, 0.0  ;;  %v915_v31 = vadd.f32 %v2946_v6, %v914_v27  ;;  %v1171_v32 = vadd.f32 %v2946_v6, %v1170_v28 }
 0x142   :  { %v2312_v33 = vpack.c.bf16 %v1280_v23, %v1280_v23  ;;  %v2376_v34 = vpack.c.bf16 %v1344_v24, %v1344_v24  ;;  %v1281_v35 = vmax.f32 %v923_v25, 0.0  ;;  %v1345_v36 = vmax.f32 %v1179_v26, 0.0 }
 0x143   :  { %v2310_v37 = vpack.c.bf16 %v1278_v29, %v1278_v29  ;;  %v2374_v38 = vpack.c.bf16 %v1342_v30, %v1342_v30  ;;  %v1279_v39 = vmax.f32 %v915_v31, 0.0  ;;  %v1343_v40 = vmax.f32 %v1171_v32, 0.0 }
 0x144   :  { %1921 = vst.msk [vmem:[%s3596_s3 + $0xc8] sm:$0xf] %vm1870_vm3, %v2312_v33  ;;  %1985 = vst.msk [vmem:[%s3596_s3 + $0x1c8] sm:$0xf] %vm1870_vm3, %v2376_v34  ;;  %v2313_v41 = vpack.c.bf16 %v1281_v35, %v1281_v35  ;;  %v2377_v6 = vpack.c.bf16 %v1345_v36, %v1345_v36 }
 0x145   :  { %1919 = vst.msk [vmem:[%s3596_s3 + $0xc0] sm:$0xf] %vm1870_vm3, %v2310_v37  ;;  %1983 = vst.msk [vmem:[%s3596_s3 + $0x1c0] sm:$0xf] %vm1870_vm3, %v2374_v38  ;;  %v2311_v42 = vpack.c.bf16 %v1279_v39, %v1279_v39  ;;  %v2375_v43 = vpack.c.bf16 %v1343_v40, %v1343_v40  ;;  %v2514_v44 = vpop.f32.mrb[52].mxu0  ;;  %v2578_v45 = vpop.f32.mrb[52].mxu1 }
 0x146   :  { %1922 = vst.msk [vmem:[%s3596_s3 + $0xcc] sm:$0xf] %vm1870_vm3, %v2313_v41  ;;  %1986 = vst.msk [vmem:[%s3596_s3 + $0x1cc] sm:$0xf] %vm1870_vm3, %v2377_v6  ;;  %v936_v47 = vadd.f32 %v3463_v46, %v2514_v44  ;;  %v1192_v48 = vadd.f32 %v3463_v46, %v2578_v45  ;;  %v927_v49 = vpop.f32.mrb[53].mxu0  ;;  %v1183_v50 = vpop.f32.mrb[53].mxu1 }
 0x147   :  { %1920 = vst.msk [vmem:[%s3596_s3 + $0xc4] sm:$0xf] %vm1870_vm3, %v2311_v42  ;;  %1984 = vst.msk [vmem:[%s3596_s3 + $0x1c4] sm:$0xf] %vm1870_vm3, %v2375_v43  ;;  %v928_v51 = vadd.f32 %v3463_v46, %v927_v49  ;;  %v1184_v52 = vadd.f32 %v3463_v46, %v1183_v50  ;;  %v2515_v53 = vpop.f32.mrb[54].mxu0  ;;  %v2579_v54 = vpop.f32.mrb[54].mxu1 }
 0x148   :  { %v1284_v55 = vmax.f32 %v936_v47, 0.0  ;;  %v1348_v56 = vmax.f32 %v1192_v48, 0.0  ;;  %v939_v57 = vadd.f32 %v3463_v46, %v2515_v53  ;;  %v1195_v58 = vadd.f32 %v3463_v46, %v2579_v54  ;;  %v930_v59 = vpop.f32.mrb[55].mxu0  ;;  %v1186_v60 = vpop.f32.mrb[55].mxu1 }
 0x149   :  { %v1282_v61 = vmax.f32 %v928_v51, 0.0  ;;  %v1346_v62 = vmax.f32 %v1184_v52, 0.0  ;;  %v931_v63 = vadd.f32 %v3463_v46, %v930_v59  ;;  %v1187_v0 = vadd.f32 %v3463_v46, %v1186_v60 }
 0x14a   :  { %v2316_v1 = vpack.c.bf16 %v1284_v55, %v1284_v55  ;;  %v2380_v2 = vpack.c.bf16 %v1348_v56, %v1348_v56  ;;  %v1285_v3 = vmax.f32 %v939_v57, 0.0  ;;  %v1349_v4 = vmax.f32 %v1195_v58, 0.0 }
 0x14b   :  { %v2314_v5 = vpack.c.bf16 %v1282_v61, %v1282_v61  ;;  %v2378_v7 = vpack.c.bf16 %v1346_v62, %v1346_v62  ;;  %v1283_v8 = vmax.f32 %v931_v63, 0.0  ;;  %v1347_v9 = vmax.f32 %v1187_v0, 0.0 }
 0x14c   :  { %1925 = vst.msk [vmem:[%s3596_s3 + $0xd8] sm:$0xf] %vm1870_vm3, %v2316_v1  ;;  %1989 = vst.msk [vmem:[%s3596_s3 + $0x1d8] sm:$0xf] %vm1870_vm3, %v2380_v2  ;;  %v2317_v10 = vpack.c.bf16 %v1285_v3, %v1285_v3  ;;  %v2381_v11 = vpack.c.bf16 %v1349_v4, %v1349_v4 }
 0x14d   :  { %1923 = vst.msk [vmem:[%s3596_s3 + $0xd0] sm:$0xf] %vm1870_vm3, %v2314_v5  ;;  %1987 = vst.msk [vmem:[%s3596_s3 + $0x1d0] sm:$0xf] %vm1870_vm3, %v2378_v7  ;;  %v2315_v12 = vpack.c.bf16 %v1283_v8, %v1283_v8  ;;  %v2379_v13 = vpack.c.bf16 %v1347_v9, %v1347_v9  ;;  %v2518_v14 = vpop.f32.mrb[56].mxu0  ;;  %v2582_v15 = vpop.f32.mrb[56].mxu1 }
 0x14e   :  { %1926 = vst.msk [vmem:[%s3596_s3 + $0xdc] sm:$0xf] %vm1870_vm3, %v2317_v10  ;;  %1990 = vst.msk [vmem:[%s3596_s3 + $0x1dc] sm:$0xf] %vm1870_vm3, %v2381_v11  ;;  %v952_v16 = vadd.f32 %v3463_v46, %v2518_v14  ;;  %v1208_v17 = vadd.f32 %v3463_v46, %v2582_v15  ;;  %v943_v18 = vpop.f32.mrb[57].mxu0  ;;  %v1199_v19 = vpop.f32.mrb[57].mxu1 }
 0x14f   :  { %1924 = vst.msk [vmem:[%s3596_s3 + $0xd4] sm:$0xf] %vm1870_vm3, %v2315_v12  ;;  %1988 = vst.msk [vmem:[%s3596_s3 + $0x1d4] sm:$0xf] %vm1870_vm3, %v2379_v13  ;;  %v944_v20 = vadd.f32 %v3463_v46, %v943_v18  ;;  %v1200_v21 = vadd.f32 %v3463_v46, %v1199_v19  ;;  %v2519_v22 = vpop.f32.mrb[58].mxu0  ;;  %v2583_v23 = vpop.f32.mrb[58].mxu1 }
 0x150   :  { %v1288_v24 = vmax.f32 %v952_v16, 0.0  ;;  %v1352_v25 = vmax.f32 %v1208_v17, 0.0  ;;  %v955_v26 = vadd.f32 %v3463_v46, %v2519_v22  ;;  %v1211_v27 = vadd.f32 %v3463_v46, %v2583_v23  ;;  %v946_v28 = vpop.f32.mrb[59].mxu0  ;;  %v1202_v29 = vpop.f32.mrb[59].mxu1 }
 0x151   :  { %v1286_v30 = vmax.f32 %v944_v20, 0.0  ;;  %v1350_v31 = vmax.f32 %v1200_v21, 0.0  ;;  %v947_v32 = vadd.f32 %v3463_v46, %v946_v28  ;;  %v1203_v33 = vadd.f32 %v3463_v46, %v1202_v29 }
 0x152   :  { %v2320_v34 = vpack.c.bf16 %v1288_v24, %v1288_v24  ;;  %v2384_v35 = vpack.c.bf16 %v1352_v25, %v1352_v25  ;;  %v1289_v36 = vmax.f32 %v955_v26, 0.0  ;;  %v1353_v37 = vmax.f32 %v1211_v27, 0.0 }
 0x153   :  { %v2318_v38 = vpack.c.bf16 %v1286_v30, %v1286_v30  ;;  %v2382_v39 = vpack.c.bf16 %v1350_v31, %v1350_v31  ;;  %v1287_v40 = vmax.f32 %v947_v32, 0.0  ;;  %v1351_v41 = vmax.f32 %v1203_v33, 0.0 }
 0x154   :  { %1929 = vst.msk [vmem:[%s3596_s3 + $0xe8] sm:$0xf] %vm1870_vm3, %v2320_v34  ;;  %1993 = vst.msk [vmem:[%s3596_s3 + $0x1e8] sm:$0xf] %vm1870_vm3, %v2384_v35  ;;  %v2321_v6 = vpack.c.bf16 %v1289_v36, %v1289_v36  ;;  %v2385_v42 = vpack.c.bf16 %v1353_v37, %v1353_v37 }
 0x155   :  { %1927 = vst.msk [vmem:[%s3596_s3 + $0xe0] sm:$0xf] %vm1870_vm3, %v2318_v38  ;;  %1991 = vst.msk [vmem:[%s3596_s3 + $0x1e0] sm:$0xf] %vm1870_vm3, %v2382_v39  ;;  %v2319_v43 = vpack.c.bf16 %v1287_v40, %v1287_v40  ;;  %v2383_v44 = vpack.c.bf16 %v1351_v41, %v1351_v41  ;;  %v2522_v45 = vpop.f32.mrb[60].mxu0  ;;  %v2586_v47 = vpop.f32.mrb[60].mxu1 }
 0x156   :  { %1930 = vst.msk [vmem:[%s3596_s3 + $0xec] sm:$0xf] %vm1870_vm3, %v2321_v6  ;;  %1994 = vst.msk [vmem:[%s3596_s3 + $0x1ec] sm:$0xf] %vm1870_vm3, %v2385_v42  ;;  %v968_v48 = vadd.f32 %v3463_v46, %v2522_v45  ;;  %v1224_v49 = vadd.f32 %v3463_v46, %v2586_v47  ;;  %v959_v50 = vpop.f32.mrb[61].mxu0  ;;  %v1215_v51 = vpop.f32.mrb[61].mxu1 }
 0x157   :  { %1928 = vst.msk [vmem:[%s3596_s3 + $0xe4] sm:$0xf] %vm1870_vm3, %v2319_v43  ;;  %1992 = vst.msk [vmem:[%s3596_s3 + $0x1e4] sm:$0xf] %vm1870_vm3, %v2383_v44  ;;  %v960_v52 = vadd.f32 %v3463_v46, %v959_v50  ;;  %v1216_v53 = vadd.f32 %v3463_v46, %v1215_v51  ;;  %v2523_v54 = vpop.f32.mrb[62].mxu0  ;;  %v2587_v55 = vpop.f32.mrb[62].mxu1 }
 0x158   :  { %v1292_v56 = vmax.f32 %v968_v48, 0.0  ;;  %v1356_v57 = vmax.f32 %v1224_v49, 0.0  ;;  %v971_v58 = vadd.f32 %v3463_v46, %v2523_v54  ;;  %v1227_v59 = vadd.f32 %v3463_v46, %v2587_v55  ;;  %v962_v60 = vpop.f32.mrb[63].mxu0  ;;  %v1218_v61 = vpop.f32.mrb[63].mxu1 }
 0x159   :  { %v1290_v62 = vmax.f32 %v960_v52, 0.0  ;;  %v1354_v63 = vmax.f32 %v1216_v53, 0.0  ;;  %v963_v0 = vadd.f32 %v3463_v46, %v962_v60  ;;  %v1219_v1 = vadd.f32 %v3463_v46, %v1218_v61 }
 0x15a   :  { %v2324_v2 = vpack.c.bf16 %v1292_v56, %v1292_v56  ;;  %v2388_v3 = vpack.c.bf16 %v1356_v57, %v1356_v57  ;;  %v1293_v4 = vmax.f32 %v971_v58, 0.0  ;;  %v1357_v5 = vmax.f32 %v1227_v59, 0.0 }
 0x15b   :  { %v2322_v7 = vpack.c.bf16 %v1290_v62, %v1290_v62  ;;  %v2386_v8 = vpack.c.bf16 %v1354_v63, %v1354_v63  ;;  %v1291_v9 = vmax.f32 %v963_v0, 0.0  ;;  %v1355_v10 = vmax.f32 %v1219_v1, 0.0 }
 0x15c   :  { %1933 = vst.msk [vmem:[%s3596_s3 + $0xf8] sm:$0xf] %vm1870_vm3, %v2324_v2  ;;  %1997 = vst.msk [vmem:[%s3596_s3 + $0x1f8] sm:$0xf] %vm1870_vm3, %v2388_v3  ;;  %v2325_v11 = vpack.c.bf16 %v1293_v4, %v1293_v4  ;;  %v2389_v46 = vpack.c.bf16 %v1357_v5, %v1357_v5 }
 0x15d   :  { %1931 = vst.msk [vmem:[%s3596_s3 + $0xf0] sm:$0xf] %vm1870_vm3, %v2322_v7  ;;  %1995 = vst.msk [vmem:[%s3596_s3 + $0x1f0] sm:$0xf] %vm1870_vm3, %v2386_v8  ;;  %v2323_v12 = vpack.c.bf16 %v1291_v9, %v1291_v9  ;;  %v2387_v13 = vpack.c.bf16 %v1355_v10, %v1355_v10 }
 0x15e   :  { %1934 = vst.msk [vmem:[%s3596_s3 + $0xfc] sm:$0xf] %vm1870_vm3, %v2325_v11  ;;  %1998 = vst.msk [vmem:[%s3596_s3 + $0x1fc] sm:$0xf] %vm1870_vm3, %v2389_v46 }
 0x15f   :  { %1932 = vst.msk [vmem:[%s3596_s3 + $0xf4] sm:$0xf] %vm1870_vm3, %v2323_v12  ;;  %1996 = vst.msk [vmem:[%s3596_s3 + $0x1f4] sm:$0xf] %vm1870_vm3, %v2387_v13 }

</bundles_post_ra>
